<compile_context>
chip_gen: v6e
topology: v6e:2x2x1
jax: 0.10.0
libtpu: 0.0.40
codegen_flags: <defaults>
</compile_context>

<pallas_src>
import functools

import jax
import jax.numpy as jnp
from jax.experimental import pallas as pl
from jax.experimental.pallas import tpu as pltpu


# ------------------------------ small helpers --------------------------------

def _round_up(x, m):
    return (x + m - 1) // m * m


def _pad_rows(a, m_pad):
    if a.shape[0] == m_pad:
        return a
    return jnp.pad(a, ((0, m_pad - a.shape[0]),) + ((0, 0),) * (a.ndim - 1))


def _choose_tile(m, tmax=512):
    return tmax if m >= tmax else _round_up(m, 8)


# ----------------------------- Pallas kernels -------------------------------

def _matmul_bias_lrelu_kernel(a_ref, w_ref, b_ref, o_ref, *, slope):
    # a: (TM, K) bf16, w: (K, 128) bf16, b: (1, 128) f32 -> o: (TM, 128) bf16 (lane-dense)
    y = jnp.dot(a_ref[...], w_ref[...], preferred_element_type=jnp.float32)
    y = y + b_ref[...]
    y = jnp.where(y >= 0, y, slope * y)
    o_ref[...] = y.astype(o_ref.dtype)


def _matmul_bias_stats_kernel(a_ref, w_ref, b_ref, y_ref, s1_ref, s2_ref):
    # conv2-as-matmul. Stats (sum, sum of squares) are accumulated on the PRE-bias
    # matmul so explicit zero-row padding contributes exactly zero (BN stays exact).
    i = pl.program_id(0)
    mm = jnp.dot(a_ref[...], w_ref[...], preferred_element_type=jnp.float32)  # (TM,128) f32

    @pl.when(i == 0)
    def _():
        s1_ref[...] = jnp.zeros_like(s1_ref)
        s2_ref[...] = jnp.zeros_like(s2_ref)

    s1_ref[...] += jnp.sum(mm, axis=0, keepdims=True)
    s2_ref[...] += jnp.sum(mm * mm, axis=0, keepdims=True)
    y_ref[...] = mm + b_ref[...]


def _bn_lrelu_linear_sigmoid_kernel(y_ref, wl_ref, sc_ref, sh_ref, bl_ref, o_ref, *, slope):
    # y: (BB, 49, 128) f32 conv2+bias output, sc/sh: (1,128) per-channel BN scale/shift,
    # wl: (49, 128) linear weight in NHWC flatten order, bl: (1,1) -> o: (BB, 1)
    y = y_ref[...]
    yn = y * sc_ref[...] + sh_ref[...]                       # BatchNorm (affine folded)
    act = jnp.where(yn >= 0, yn, slope * yn)                 # LeakyReLU(0.2)
    prod = act * wl_ref[...]                                 # (BB, 49, 128)
    z = jnp.sum(jnp.sum(prod, axis=2), axis=1, keepdims=True) + bl_ref[...]   # (BB, 1)
    # numerically stable sigmoid (exact, stays in [0, 1])
    pos = z >= 0
    ez = jnp.exp(jnp.where(pos, -z, z))
    o_ref[...] = jnp.where(pos, 1.0, ez) / (1.0 + ez)


# ------------------------------ kernel wrappers -------------------------------

def conv_matmul_bias_lrelu(patches, w_mat, bias, *, slope=0.2, tm_max=512):
    """conv1 as tiled matmul + bias + LeakyReLU. Returns (M, 128) bf16 (lane-dense)."""
    M, K = patches.shape
    N = w_mat.shape[1]
    tm = _choose_tile(M, tm_max)
    m_pad = _round_up(M, tm)
    a = _pad_rows(patches, m_pad)

    flops = 2 * m_pad * K * N
    bytes_accessed = m_pad * K * 2 + K * N * 2 + N * 4 + m_pad * N * 2

    out = pl.pallas_call(
        functools.partial(_matmul_bias_lrelu_kernel, slope=slope),
        out_shape=jax.ShapeDtypeStruct((m_pad, N), jnp.bfloat16),
        grid=(m_pad // tm,),
        in_specs=[
            pl.BlockSpec((tm, K), lambda i: (i, 0)),
            pl.BlockSpec((K, N), lambda i: (0, 0)),
            pl.BlockSpec((1, N), lambda i: (0, 0)),
        ],
        out_specs=pl.BlockSpec((tm, N), lambda i: (i, 0)),
        compiler_params=pltpu.CompilerParams(dimension_semantics=("parallel",)),
        cost_estimate=pl.CostEstimate(flops=flops, transcendentals=0,
                                      bytes_accessed=bytes_accessed),
    )(a, w_mat, bias.reshape(1, N))
    return out[:M]


def conv_matmul_bias_stats(patches, w_mat, bias, *, tm_max=512):
    """conv2 as tiled matmul + bias; also returns per-channel pre-bias sum / sumsq."""
    M, K = patches.shape
    N = w_mat.shape[1]
    tm = _choose_tile(M, tm_max)
    m_pad = _round_up(M, tm)
    a = _pad_rows(patches, m_pad)

    flops = 2 * m_pad * K * N
    bytes_accessed = m_pad * K * 2 + K * N * 2 + N * 4 + m_pad * N * 4 + 2 * N * 4

    y, s1, s2 = pl.pallas_call(
        _matmul_bias_stats_kernel,
        out_shape=(jax.ShapeDtypeStruct((m_pad, N), jnp.float32),
                   jax.ShapeDtypeStruct((1, N), jnp.float32),
                   jax.ShapeDtypeStruct((1, N), jnp.float32)),
        grid=(m_pad // tm,),
        in_specs=[
            pl.BlockSpec((tm, K), lambda i: (i, 0)),
            pl.BlockSpec((K, N), lambda i: (0, 0)),
            pl.BlockSpec((1, N), lambda i: (0, 0)),
        ],
        out_specs=(pl.BlockSpec((tm, N), lambda i: (i, 0)),
                   pl.BlockSpec((1, N), lambda i: (0, 0)),     # resident accumulator
                   pl.BlockSpec((1, N), lambda i: (0, 0))),    # resident accumulator
        compiler_params=pltpu.CompilerParams(dimension_semantics=("arbitrary",)),
        cost_estimate=pl.CostEstimate(flops=flops, transcendentals=0,
                                      bytes_accessed=bytes_accessed),
    )(a, w_mat, bias.reshape(1, N))
    return y, s1[0], s2[0]


def bn_lrelu_linear_sigmoid(y_b, wl_hw_c, scale, shift, bl, *, slope=0.2, bb=8):
    """Fused BN-normalize + LeakyReLU + Linear(6272,1) + Sigmoid. y_b: (Bp, 49, 128)."""
    Bp, HW, C = y_b.shape
    return pl.pallas_call(
        functools.partial(_bn_lrelu_linear_sigmoid_kernel, slope=slope),
        out_shape=jax.ShapeDtypeStruct((Bp, 1), jnp.float32),
        grid=(Bp // bb,),
        in_specs=[
            pl.BlockSpec((bb, HW, C), lambda i: (i, 0, 0)),
            pl.BlockSpec((HW, C), lambda i: (0, 0)),
            pl.BlockSpec((1, C), lambda i: (0, 0)),
            pl.BlockSpec((1, C), lambda i: (0, 0)),
            pl.BlockSpec((1, 1), lambda i: (0, 0)),
        ],
        out_specs=pl.BlockSpec((bb, 1), lambda i: (i, 0)),
        compiler_params=pltpu.CompilerParams(dimension_semantics=("parallel",)),
    )(y_b, wl_hw_c, scale.reshape(1, C), shift.reshape(1, C), bl.reshape(1, 1))


# ------------------------------- JAX glue ------------------------------------

def im2col(x_nhwc, k, s, p):
    """Extract (k,k) patches with stride s, padding p. Returns (B*Ho*Wo, k*k*C)."""
    x = jnp.pad(x_nhwc, ((0, 0), (p, p), (p, p), (0, 0)))
    B, Hp, Wp, C = x.shape
    Ho = (Hp - k) // s + 1
    Wo = (Wp - k) // s + 1
    cols = []
    for i in range(k):
        for j in range(k):
            cols.append(x[:, i:i + s * Ho:s, j:j + s * Wo:s, :])   # (B, Ho, Wo, C)
    patches = jnp.stack(cols, axis=3)                               # (B, Ho, Wo, k*k, C)
    return patches.reshape(B * Ho * Wo, k * k * C), (B, Ho, Wo)


def conv_w_to_mat(w):
    """(Cout, Cin, kh, kw) -> (kh*kw*Cin, Cout), matching im2col patch ordering."""
    Cout, Cin, kh, kw = w.shape
    return jnp.transpose(w, (2, 3, 1, 0)).reshape(kh * kw * Cin, Cout)


def init_params(key, embed_dim=1, num_classes=10):
    ks = jax.random.split(key, 7)
    return {
        "emb": jax.random.normal(ks[0], (num_classes, embed_dim), jnp.float32),
        "w1": jax.random.normal(ks[1], (64, 2, 4, 4), jnp.float32) * 0.1,
        "b1": jax.random.normal(ks[2], (64,), jnp.float32) * 0.1,
        "w2": jax.random.normal(ks[3], (128, 64, 4, 4), jnp.float32) * 0.05,
        "b2": jax.random.normal(ks[4], (128,), jnp.float32) * 0.05,
        "gamma": jnp.ones((128,), jnp.float32),   # BatchNorm2d default init
        "beta": jnp.zeros((128,), jnp.float32),
        "wl": jax.random.normal(ks[5], (1, 128 * 7 * 7), jnp.float32) * 0.01,
        "bl": jax.random.normal(ks[6], (1,), jnp.float32) * 0.01,
    }


def cnn_discriminator_forward(params, x_nchw, labels, *, eps=1e-5, slope=0.2):
    B = x_nchw.shape[0]

    # label embedding -> (B, 1, 28, 28) "label image" (embed_dim must be 1, as in torch.expand)
    emb = jnp.take(params["emb"], labels, axis=0)                    # (B, 1)
    label_img = jnp.broadcast_to(emb[:, :, None, None], (B, 1, 28, 28))
    x = jnp.concatenate([x_nchw, label_img], axis=1)                 # (B, 2, 28, 28)
    x_nhwc = jnp.transpose(x, (0, 2, 3, 1))

    # --- Conv2d(2, 64, 4, s=2, p=1) + LeakyReLU(0.2), lane-dense (Cout padded to 128) ---
    p1, (_, H1, W1) = im2col(x_nhwc, 4, 2, 1)                        # (B*196, 32)
    p1 = p1.astype(jnp.bfloat16)
    w1m = conv_w_to_mat(params["w1"]).astype(jnp.bfloat16)           # (32, 64)
    w1m = jnp.pad(w1m, ((0, 0), (0, 128 - w1m.shape[1])))            # (32, 128), zero pad
    b1 = jnp.pad(params["b1"], (0, 128 - params["b1"].shape[0]))     # (128,)
    y1 = conv_matmul_bias_lrelu(p1, w1m, b1, slope=slope)            # (B*196, 128) bf16
    y1 = y1.reshape(B, H1, W1, 128)[..., :64]                        # drop zero pad channels

    # --- Conv2d(64, 128, 4, s=2, p=1) + bias, with in-kernel BN-stat accumulation ---
    # TODO(synk): replace im2col with implicit-GEMM (16 shifted in-kernel dots over y1
    # tiles) to avoid materializing the 16x-duplicated patch matrix in HBM at large batch.
    p2, (_, H2, W2) = im2col(y1, 4, 2, 1)                            # (B*49, 1024) bf16
    w2m = conv_w_to_mat(params["w2"]).astype(jnp.bfloat16)           # (1024, 128)
    y2, s1, s2 = conv_matmul_bias_stats(p2, w2m, params["b2"])       # y2: (M2p, 128) f32

    # BatchNorm2d training-mode batch stats (biased variance over N*H*W), exact
    # because s1/s2 exclude the bias and zero-padded rows contribute nothing.
    m_true = jnp.float32(B * H2 * W2)
    mean_z = s1 / m_true
    mean = mean_z + params["b2"]
    var = jnp.maximum(s2 / m_true - mean_z * mean_z, 0.0)
    inv_std = jax.lax.rsqrt(var + eps)
    scale = params["gamma"] * inv_std
    shift = params["beta"] - mean * scale

    # Linear weight permuted once to NHWC flatten order (c*49 + h*7 + w -> [h*7+w, c]),
    # removing the per-forward NHWC->NCHW transpose of the activations.
    wl = params["wl"].reshape(128, H2, W2).transpose(1, 2, 0).reshape(H2 * W2, 128)

    # --- fused BN normalize + LeakyReLU + Flatten + Linear(6272,1) + Sigmoid ---
    bb = 8
    Bp = _round_up(B, bb)
    y2 = y2[:B * H2 * W2].reshape(B, H2 * W2, 128)
    if Bp != B:
        y2 = jnp.pad(y2, ((0, Bp - B), (0, 0), (0, 0)))
    out = bn_lrelu_linear_sigmoid(y2, wl, scale, shift, params["bl"], slope=slope, bb=bb)
    return out[:B]                                                    # (B, 1)


if __name__ == "__main__":
    key = jax.random.PRNGKey(0)
    kx, kl, kp = jax.random.split(key, 3)

    B, num_classes, embed_dim = 2, 10, 1
    x = jax.random.normal(kx, (B, 1, 28, 28), jnp.float32)           # Fashion-MNIST sized input
    labels = jax.random.randint(kl, (B,), 0, num_classes)

    params = init_params(kp, embed_dim=embed_dim, num_classes=num_classes)

    fwd = jax.jit(cnn_discriminator_forward)
    out = jax.block_until_ready(fwd(params, x, labels))

    assert out.shape == (B, 1), out.shape
    assert out.dtype == jnp.float32
    assert bool(jnp.all(jnp.isfinite(out)))
    assert bool(jnp.all((out >= 0.0) & (out <= 1.0)))
    print("KERNEL_OK")
</pallas_src>

<mosaic_0001>
module attributes {stable_mosaic.version = 11 : i64} {
  func.func @_matmul_bias_lrelu_kernel(%arg0: i32, %arg1: memref<392x32xbf16, #tpu.memory_space<vmem>>, %arg2: memref<32x128xbf16, #tpu.memory_space<vmem>>, %arg3: memref<1x128xf32, #tpu.memory_space<vmem>>, %arg4: memref<392x128xbf16, #tpu.memory_space<vmem>>) attributes {dimension_semantics = [#tpu.dimension_semantics<parallel>], iteration_bounds = array<i64: 1>, scalar_prefetch = 0 : i64, scratch_operands = 0 : i64, tpu.core_type = #tpu.core_type<tc>, window_params = [{transform_indices = @transform_0, window_bounds = array<i64: 392, 32>}, {pipeline_mode = #tpu.pipeline_mode<synchronous>, transform_indices = @transform_1, window_bounds = array<i64: 32, 128>}, {pipeline_mode = #tpu.pipeline_mode<synchronous>, transform_indices = @transform_2, window_bounds = array<i64: 1, 128>}, {transform_indices = @transform_3, window_bounds = array<i64: 392, 128>}]} {
    %c0 = arith.constant 0 : index
    %c0_0 = arith.constant 0 : index
    %0 = vector.load %arg1[%c0, %c0_0] : memref<392x32xbf16, #tpu.memory_space<vmem>>, vector<392x32xbf16>
    %c0_1 = arith.constant 0 : index
    %c0_2 = arith.constant 0 : index
    %1 = vector.load %arg2[%c0_1, %c0_2] : memref<32x128xbf16, #tpu.memory_space<vmem>>, vector<32x128xbf16>
    %cst = arith.constant dense<0.000000e+00> : vector<392x128xf32>
    %2 = tpu.matmul %0, %1, %cst {dimension_numbers = #tpu.dot_dimension_numbers<[1], [0], [0], [1], [0, 0, 1, 1], [], []>} : vector<392x32xbf16>, vector<32x128xbf16>, vector<392x128xf32> -> vector<392x128xf32>
    %c0_3 = arith.constant 0 : index
    %c0_4 = arith.constant 0 : index
    %3 = vector.load %arg3[%c0_3, %c0_4] : memref<1x128xf32, #tpu.memory_space<vmem>>, vector<1x128xf32>
    %4 = vector.broadcast %3 : vector<1x128xf32> to vector<392x128xf32>
    %5 = arith.addf %2, %4 : vector<392x128xf32>
    %cst_5 = arith.constant 0.000000e+00 : f32
    %6 = vector.broadcast %cst_5 : f32 to vector<392x128xf32>
    %7 = arith.cmpf oge, %5, %6 : vector<392x128xf32>
    %cst_6 = arith.constant 2.000000e-01 : f32
    %8 = vector.broadcast %cst_6 : f32 to vector<392x128xf32>
    %9 = arith.mulf %8, %5 : vector<392x128xf32>
    %10 = arith.select %7, %5, %9 : vector<392x128xi1>, vector<392x128xf32>
    %11 = arith.truncf %10 : vector<392x128xf32> to vector<392x128xbf16>
    %c0_7 = arith.constant 0 : index
    %c0_8 = arith.constant 0 : index
    %12 = vector.load %arg4[%c0_7, %c0_8] : memref<392x128xbf16, #tpu.memory_space<vmem>>, vector<392x128xbf16>
    tpu.vector_store %arg4[%c0_7, %c0_8], %11 {strides = array<i32>} : memref<392x128xbf16, #tpu.memory_space<vmem>>, vector<392x128xbf16>,
    return
  }
  func.func @transform_0(%arg0: i32) -> (i32, i32) {
    %c0_i32 = arith.constant 0 : i32
    %c0_i32_0 = arith.constant 0 : i32
    return %arg0, %c0_i32 : i32, i32
  }
  func.func @transform_1(%arg0: i32) -> (i32, i32) {
    %c0_i32 = arith.constant 0 : i32
    %c0_i32_0 = arith.constant 0 : i32
    %c0_i32_1 = arith.constant 0 : i32
    return %c0_i32, %c0_i32_0 : i32, i32
  }
  func.func @transform_2(%arg0: i32) -> (i32, i32) {
    %c0_i32 = arith.constant 0 : i32
    %c0_i32_0 = arith.constant 0 : i32
    %c0_i32_1 = arith.constant 0 : i32
    return %c0_i32, %c0_i32_0 : i32, i32
  }
  func.func @transform_3(%arg0: i32) -> (i32, i32) {
    %c0_i32 = arith.constant 0 : i32
    %c0_i32_0 = arith.constant 0 : i32
    return %arg0, %c0_i32 : i32, i32
  }
}

module attributes {stable_mosaic.version = 11 : i64} {
  func.func @_matmul_bias_stats_kernel(%arg0: i32, %arg1: memref<104x1024xbf16, #tpu.memory_space<vmem>>, %arg2: memref<1024x128xbf16, #tpu.memory_space<vmem>>, %arg3: memref<1x128xf32, #tpu.memory_space<vmem>>, %arg4: memref<104x128xf32, #tpu.memory_space<vmem>>, %arg5: memref<1x128xf32, #tpu.memory_space<vmem>>, %arg6: memref<1x128xf32, #tpu.memory_space<vmem>>) attributes {dimension_semantics = [#tpu.dimension_semantics<arbitrary>], iteration_bounds = array<i64: 1>, scalar_prefetch = 0 : i64, scratch_operands = 0 : i64, tpu.core_type = #tpu.core_type<tc>, window_params = [{transform_indices = @transform_0, window_bounds = array<i64: 104, 1024>}, {pipeline_mode = #tpu.pipeline_mode<synchronous>, transform_indices = @transform_1, window_bounds = array<i64: 1024, 128>}, {pipeline_mode = #tpu.pipeline_mode<synchronous>, transform_indices = @transform_2, window_bounds = array<i64: 1, 128>}, {transform_indices = @transform_3, window_bounds = array<i64: 104, 128>}, {pipeline_mode = #tpu.pipeline_mode<synchronous>, transform_indices = @transform_4, window_bounds = array<i64: 1, 128>}, {pipeline_mode = #tpu.pipeline_mode<synchronous>, transform_indices = @transform_5, window_bounds = array<i64: 1, 128>}]} {
    %c0 = arith.constant 0 : index
    %c0_0 = arith.constant 0 : index
    %0 = vector.load %arg1[%c0, %c0_0] : memref<104x1024xbf16, #tpu.memory_space<vmem>>, vector<104x1024xbf16>
    %c0_1 = arith.constant 0 : index
    %c0_2 = arith.constant 0 : index
    %1 = vector.load %arg2[%c0_1, %c0_2] : memref<1024x128xbf16, #tpu.memory_space<vmem>>, vector<1024x128xbf16>
    %cst = arith.constant dense<0.000000e+00> : vector<104x128xf32>
    %2 = tpu.matmul %0, %1, %cst {dimension_numbers = #tpu.dot_dimension_numbers<[1], [0], [0], [1], [0, 0, 1, 1], [], []>} : vector<104x1024xbf16>, vector<1024x128xbf16>, vector<104x128xf32> -> vector<104x128xf32>
    %c0_i32 = arith.constant 0 : i32
    %3 = arith.cmpi eq, %arg0, %c0_i32 : i32
    %4 = arith.extui %3 : i1 to i32
    %c0_i32_3 = arith.constant 0 : i32
    %5 = arith.cmpi ne, %4, %c0_i32_3 : i32
    scf.if %5 {
      %cst_18 = arith.constant 0.000000e+00 : f32
      %21 = vector.broadcast %cst_18 : f32 to vector<1x128xf32>
      %c0_19 = arith.constant 0 : index
      %c0_20 = arith.constant 0 : index
      %22 = vector.load %arg5[%c0_19, %c0_20] : memref<1x128xf32, #tpu.memory_space<vmem>>, vector<1x128xf32>
      tpu.vector_store %arg5[%c0_19, %c0_20], %21 {strides = array<i32>} : memref<1x128xf32, #tpu.memory_space<vmem>>, vector<1x128xf32>,
      %cst_21 = arith.constant 0.000000e+00 : f32
      %23 = vector.broadcast %cst_21 : f32 to vector<1x128xf32>
      %c0_22 = arith.constant 0 : index
      %c0_23 = arith.constant 0 : index
      %24 = vector.load %arg6[%c0_22, %c0_23] : memref<1x128xf32, #tpu.memory_space<vmem>>, vector<1x128xf32>
      tpu.vector_store %arg6[%c0_22, %c0_23], %23 {strides = array<i32>} : memref<1x128xf32, #tpu.memory_space<vmem>>, vector<1x128xf32>,
    } else {
    }
    %c0_4 = arith.constant 0 : index
    %c0_5 = arith.constant 0 : index
    %6 = vector.load %arg5[%c0_4, %c0_5] : memref<1x128xf32, #tpu.memory_space<vmem>>, vector<1x128xf32>
    %cst_6 = arith.constant dense<0.000000e+00> : vector<128xf32>
    %7 = vector.multi_reduction <add>, %2, %cst_6 [0] : vector<104x128xf32> to vector<128xf32>
    %8 = vector.shape_cast %7 : vector<128xf32> to vector<1x128xf32>
    %9 = arith.addf %6, %8 : vector<1x128xf32>
    %c0_7 = arith.constant 0 : index
    %c0_8 = arith.constant 0 : index
    %10 = vector.load %arg5[%c0_7, %c0_8] : memref<1x128xf32, #tpu.memory_space<vmem>>, vector<1x128xf32>
    tpu.vector_store %arg5[%c0_7, %c0_8], %9 {strides = array<i32>} : memref<1x128xf32, #tpu.memory_space<vmem>>, vector<1x128xf32>,
    %c0_9 = arith.constant 0 : index
    %c0_10 = arith.constant 0 : index
    %11 = vector.load %arg6[%c0_9, %c0_10] : memref<1x128xf32, #tpu.memory_space<vmem>>, vector<1x128xf32>
    %12 = arith.mulf %2, %2 : vector<104x128xf32>
    %cst_11 = arith.constant dense<0.000000e+00> : vector<128xf32>
    %13 = vector.multi_reduction <add>, %12, %cst_11 [0] : vector<104x128xf32> to vector<128xf32>
    %14 = vector.shape_cast %13 : vector<128xf32> to vector<1x128xf32>
    %15 = arith.addf %11, %14 : vector<1x128xf32>
    %c0_12 = arith.constant 0 : index
    %c0_13 = arith.constant 0 : index
    %16 = vector.load %arg6[%c0_12, %c0_13] : memref<1x128xf32, #tpu.memory_space<vmem>>, vector<1x128xf32>
    tpu.vector_store %arg6[%c0_12, %c0_13], %15 {strides = array<i32>} : memref<1x128xf32, #tpu.memory_space<vmem>>, vector<1x128xf32>,
    %c0_14 = arith.constant 0 : index
    %c0_15 = arith.constant 0 : index
    %17 = vector.load %arg3[%c0_14, %c0_15] : memref<1x128xf32, #tpu.memory_space<vmem>>, vector<1x128xf32>
    %18 = vector.broadcast %17 : vector<1x128xf32> to vector<104x128xf32>
    %19 = arith.addf %2, %18 : vector<104x128xf32>
    %c0_16 = arith.constant 0 : index
    %c0_17 = arith.constant 0 : index
    %20 = vector.load %arg4[%c0_16, %c0_17] : memref<104x128xf32, #tpu.memory_space<vmem>>, vector<104x128xf32>
    tpu.vector_store %arg4[%c0_16, %c0_17], %19 {strides = array<i32>} : memref<104x128xf32, #tpu.memory_space<vmem>>, vector<104x128xf32>,
    return
  }
  func.func @transform_0(%arg0: i32) -> (i32, i32) {
    %c0_i32 = arith.constant 0 : i32
    %c0_i32_0 = arith.constant 0 : i32
    return %arg0, %c0_i32 : i32, i32
  }
  func.func @transform_1(%arg0: i32) -> (i32, i32) {
    %c0_i32 = arith.constant 0 : i32
    %c0_i32_0 = arith.constant 0 : i32
    %c0_i32_1 = arith.constant 0 : i32
    return %c0_i32, %c0_i32_0 : i32, i32
  }
  func.func @transform_2(%arg0: i32) -> (i32, i32) {
    %c0_i32 = arith.constant 0 : i32
    %c0_i32_0 = arith.constant 0 : i32
    %c0_i32_1 = arith.constant 0 : i32
    return %c0_i32, %c0_i32_0 : i32, i32
  }
  func.func @transform_3(%arg0: i32) -> (i32, i32) {
    %c0_i32 = arith.constant 0 : i32
    %c0_i32_0 = arith.constant 0 : i32
    return %arg0, %c0_i32 : i32, i32
  }
  func.func @transform_4(%arg0: i32) -> (i32, i32) {
    %c0_i32 = arith.constant 0 : i32
    %c0_i32_0 = arith.constant 0 : i32
    %c0_i32_1 = arith.constant 0 : i32
    return %c0_i32, %c0_i32_0 : i32, i32
  }
  func.func @transform_5(%arg0: i32) -> (i32, i32) {
    %c0_i32 = arith.constant 0 : i32
    %c0_i32_0 = arith.constant 0 : i32
    %c0_i32_1 = arith.constant 0 : i32
    return %c0_i32, %c0_i32_0 : i32, i32
  }
}

module attributes {stable_mosaic.version = 11 : i64} {
  func.func @_bn_lrelu_linear_sigmoid_kernel(%arg0: i32, %arg1: memref<8x49x128xf32, #tpu.memory_space<vmem>>, %arg2: memref<49x128xf32, #tpu.memory_space<vmem>>, %arg3: memref<1x128xf32, #tpu.memory_space<vmem>>, %arg4: memref<1x128xf32, #tpu.memory_space<vmem>>, %arg5: memref<1x1xf32, #tpu.memory_space<vmem>>, %arg6: memref<8x1xf32, #tpu.memory_space<vmem>>) attributes {dimension_semantics = [#tpu.dimension_semantics<parallel>], iteration_bounds = array<i64: 1>, scalar_prefetch = 0 : i64, scratch_operands = 0 : i64, tpu.core_type = #tpu.core_type<tc>, window_params = [{transform_indices = @transform_0, window_bounds = array<i64: 8, 49, 128>}, {pipeline_mode = #tpu.pipeline_mode<synchronous>, transform_indices = @transform_1, window_bounds = array<i64: 49, 128>}, {pipeline_mode = #tpu.pipeline_mode<synchronous>, transform_indices = @transform_2, window_bounds = array<i64: 1, 128>}, {pipeline_mode = #tpu.pipeline_mode<synchronous>, transform_indices = @transform_3, window_bounds = array<i64: 1, 128>}, {pipeline_mode = #tpu.pipeline_mode<synchronous>, transform_indices = @transform_4, window_bounds = array<i64: 1, 1>}, {transform_indices = @transform_5, window_bounds = array<i64: 8, 1>}]} {
    %c0 = arith.constant 0 : index
    %c0_0 = arith.constant 0 : index
    %c0_1 = arith.constant 0 : index
    %0 = vector.load %arg1[%c0, %c0_0, %c0_1] : memref<8x49x128xf32, #tpu.memory_space<vmem>>, vector<8x49x128xf32>
    %c0_2 = arith.constant 0 : index
    %c0_3 = arith.constant 0 : index
    %1 = vector.load %arg3[%c0_2, %c0_3] : memref<1x128xf32, #tpu.memory_space<vmem>>, vector<1x128xf32>
    %2 = vector.shape_cast %1 : vector<1x128xf32> to vector<1x1x128xf32>
    %3 = vector.broadcast %2 : vector<1x1x128xf32> to vector<8x49x128xf32>
    %4 = arith.mulf %0, %3 : vector<8x49x128xf32>
    %c0_4 = arith.constant 0 : index
    %c0_5 = arith.constant 0 : index
    %5 = vector.load %arg4[%c0_4, %c0_5] : memref<1x128xf32, #tpu.memory_space<vmem>>, vector<1x128xf32>
    %6 = vector.shape_cast %5 : vector<1x128xf32> to vector<1x1x128xf32>
    %7 = vector.broadcast %6 : vector<1x1x128xf32> to vector<8x49x128xf32>
    %8 = arith.addf %4, %7 : vector<8x49x128xf32>
    %cst = arith.constant 0.000000e+00 : f32
    %9 = vector.broadcast %cst : f32 to vector<8x49x128xf32>
    %10 = arith.cmpf oge, %8, %9 : vector<8x49x128xf32>
    %cst_6 = arith.constant 2.000000e-01 : f32
    %11 = vector.broadcast %cst_6 : f32 to vector<8x49x128xf32>
    %12 = arith.mulf %11, %8 : vector<8x49x128xf32>
    %13 = arith.select %10, %8, %12 : vector<8x49x128xi1>, vector<8x49x128xf32>
    %c0_7 = arith.constant 0 : index
    %c0_8 = arith.constant 0 : index
    %14 = vector.load %arg2[%c0_7, %c0_8] : memref<49x128xf32, #tpu.memory_space<vmem>>, vector<49x128xf32>
    %15 = vector.shape_cast %14 : vector<49x128xf32> to vector<1x49x128xf32>
    %16 = vector.broadcast %15 : vector<1x49x128xf32> to vector<8x49x128xf32>
    %17 = arith.mulf %13, %16 : vector<8x49x128xf32>
    %cst_9 = arith.constant dense<0.000000e+00> : vector<8x49xf32>
    %18 = vector.multi_reduction <add>, %17, %cst_9 [2] : vector<8x49x128xf32> to vector<8x49xf32>
    %cst_10 = arith.constant dense<0.000000e+00> : vector<8xf32>
    %19 = vector.multi_reduction <add>, %18, %cst_10 [1] : vector<8x49xf32> to vector<8xf32>
    %20 = vector.shape_cast %19 : vector<8xf32> to vector<8x1xf32>
    %c0_11 = arith.constant 0 : index
    %c0_12 = arith.constant 0 : index
    %21 = vector.load %arg5[%c0_11, %c0_12] : memref<1x1xf32, #tpu.memory_space<vmem>>, vector<1x1xf32>
    %22 = vector.broadcast %21 : vector<1x1xf32> to vector<8x1xf32>
    %23 = arith.addf %20, %22 : vector<8x1xf32>
    %cst_13 = arith.constant 0.000000e+00 : f32
    %24 = vector.broadcast %cst_13 : f32 to vector<8x1xf32>
    %25 = arith.cmpf oge, %23, %24 : vector<8x1xf32>
    %cst_14 = arith.constant 0.000000e+00 : f32
    %26 = vector.broadcast %cst_14 : f32 to vector<8x1xf32>
    %27 = arith.subf %26, %23 : vector<8x1xf32>
    %28 = arith.select %25, %27, %23 : vector<8x1xi1>, vector<8x1xf32>
    %29 = math.exp %28 : vector<8x1xf32>
    %cst_15 = arith.constant 1.000000e+00 : f32
    %30 = vector.broadcast %cst_15 : f32 to vector<8x1xf32>
    %31 = arith.select %25, %30, %29 : vector<8x1xi1>, vector<8x1xf32>
    %cst_16 = arith.constant 1.000000e+00 : f32
    %32 = vector.broadcast %cst_16 : f32 to vector<8x1xf32>
    %33 = arith.addf %32, %29 : vector<8x1xf32>
    %34 = arith.divf %31, %33 : vector<8x1xf32>
    %c0_17 = arith.constant 0 : index
    %c0_18 = arith.constant 0 : index
    %35 = vector.load %arg6[%c0_17, %c0_18] : memref<8x1xf32, #tpu.memory_space<vmem>>, vector<8x1xf32>
    tpu.vector_store %arg6[%c0_17, %c0_18], %34 {strides = array<i32>} : memref<8x1xf32, #tpu.memory_space<vmem>>, vector<8x1xf32>,
    return
  }
  func.func @transform_0(%arg0: i32) -> (i32, i32, i32) {
    %c0_i32 = arith.constant 0 : i32
    %c0_i32_0 = arith.constant 0 : i32
    %c0_i32_1 = arith.constant 0 : i32
    return %arg0, %c0_i32, %c0_i32_0 : i32, i32, i32
  }
  func.func @transform_1(%arg0: i32) -> (i32, i32) {
    %c0_i32 = arith.constant 0 : i32
    %c0_i32_0 = arith.constant 0 : i32
    %c0_i32_1 = arith.constant 0 : i32
    return %c0_i32, %c0_i32_0 : i32, i32
  }
  func.func @transform_2(%arg0: i32) -> (i32, i32) {
    %c0_i32 = arith.constant 0 : i32
    %c0_i32_0 = arith.constant 0 : i32
    %c0_i32_1 = arith.constant 0 : i32
    return %c0_i32, %c0_i32_0 : i32, i32
  }
  func.func @transform_3(%arg0: i32) -> (i32, i32) {
    %c0_i32 = arith.constant 0 : i32
    %c0_i32_0 = arith.constant 0 : i32
    %c0_i32_1 = arith.constant 0 : i32
    return %c0_i32, %c0_i32_0 : i32, i32
  }
  func.func @transform_4(%arg0: i32) -> (i32, i32) {
    %c0_i32 = arith.constant 0 : i32
    %c0_i32_0 = arith.constant 0 : i32
    %c0_i32_1 = arith.constant 0 : i32
    return %c0_i32, %c0_i32_0 : i32, i32
  }
  func.func @transform_5(%arg0: i32) -> (i32, i32) {
    %c0_i32 = arith.constant 0 : i32
    %c0_i32_0 = arith.constant 0 : i32
    return %arg0, %c0_i32 : i32, i32
  }
}

</mosaic_0001>

<bundles_post_ra>
// kernel: cnn_discriminator_forward.3
= control target key start
LH: loop header
LB: loop body
LE: loop exit
PB: predicated region body
PF: predicated region fallthrough
CT: control target
= control target key end

     0   :  { %v1373_v0 = vmov 0.0   ;;  %vm1374_vm0 = vmmov 0   ;;  %vm210_vm1 = vcmask 261120   ;;  %s1684_s1 = inlined_call_operand.vmem [shape: bf16[32,128], index: 1, kind: input, shape index: {}]   ;;  %s1685_s0 = inlined_call_operand.vmem [shape: bf16[392,32], index: 0, kind: input, shape index: {}]   ;;  %s1686_s2 = inlined_call_operand.vmem [shape: f32[1,128], index: 2, kind: input, shape index: {}]   ;;  %s1687_s3 = inlined_call_operand.vmem [shape: bf16[392,128], index: 3, kind: output, shape index: {}]  }
   0x1   :  { %1236 = vmatprep.subr.bf16.mxu0 %v1373_v0  ;;  %v1346_v1 = vld [vmem:[%s1684_s1 + $0x8] sm:$0xff]   ;;  %1340 = vmatprep.subr.bf16.mxu1 %v1373_v0  ;;  %v1347_v2 = vld [vmem:[%s1684_s1] sm:$0xff]   ;;  %v1351_v6 = vld [vmem:[%s1685_s0 + $0x70] sm:$0xff]  }
   0x2   :  { %1240 = vmatprep.mubr.msk.bf16.mxu0 %vm1374_vm0, %v1373_v0  ;;  %1292 = vmatprep.mubr.msk.bf16.mxu1 %vm1374_vm0, %v1373_v0  ;;  %v1348_v3 = vld [vmem:[%s1685_s0] sm:$0xff]   ;;  %v1349_v4 = vld [vmem:[%s1685_s0 + $0x68] sm:$0xff]   ;;  %v1352_v7 = vld [vmem:[%s1685_s0 + $0x10] sm:$0xff]  }
   0x3   :  { %1237 = vmatpush3.bf16.msra.mxu0 %v1346_v1  ;;  %1342 = vmatpush3.bf16.msra.mxu1 %v1346_v1  ;;  %v1350_v5 = vld [vmem:[%s1685_s0 + $0x8] sm:$0xff]   ;;  %v1353_v8 = vld [vmem:[%s1685_s0 + $0x78] sm:$0xff]   ;;  %v1355_v10 = vld [vmem:[%s1685_s0 + $0x80] sm:$0xff]  }
   0x4   :  { %1238 = vmatprep.subr.bf16.mxu0 %v1373_v0  ;;  %1341 = vmatprep.subr.bf16.mxu1 %v1373_v0  ;;  %v1354_v9 = vld [vmem:[%s1685_s0 + $0x18] sm:$0xff]   ;;  %v1356_v11 = vld [vmem:[%s1685_s0 + $0x20] sm:$0xff]   ;;  %v1357_v12 = vld [vmem:[%s1685_s0 + $0x88] sm:$0xff]  }
   0x5   :  { %v1358_v13 = vld [vmem:[%s1685_s0 + $0x28] sm:$0xff]   ;;  %v1359_v14 = vld [vmem:[%s1685_s0 + $0x90] sm:$0xff]   ;;  %v1361_v16 = vld [vmem:[%s1685_s0 + $0x98] sm:$0xff]  }
   0x6   :  { %v1360_v15 = vld [vmem:[%s1685_s0 + $0x30] sm:$0xff]   ;;  %v1362_v17 = vld [vmem:[%s1685_s0 + $0x38] sm:$0xff]   ;;  %v1363_v18 = vld [vmem:[%s1685_s0 + $0xa0] sm:$0xff]  }
   0x7   :  { %1239 = vmatpush3.bf16.msra.mxu0 %v1347_v2  ;;  %1343 = vmatpush3.bf16.msra.mxu1 %v1347_v2  ;;  %v1364_v19 = vld [vmem:[%s1685_s0 + $0x40] sm:$0xff]   ;;  %v1365_v20 = vld [vmem:[%s1685_s0 + $0xa8] sm:$0xff]   ;;  %v1367_v22 = vld [vmem:[%s1685_s0 + $0xb0] sm:$0xff]  }
   0x8   :  { %v1366_v21 = vld [vmem:[%s1685_s0 + $0x48] sm:$0xff]   ;;  %v1368_v23 = vld [vmem:[%s1685_s0 + $0x50] sm:$0xff]   ;;  %v1369_v24 = vld [vmem:[%s1685_s0 + $0xb8] sm:$0xff]  }
   0x9   :  { %v1370_v25 = vld [vmem:[%s1685_s0 + $0x58] sm:$0xff]   ;;  %v1371_v26 = vld [vmem:[%s1685_s0 + $0xc0] ss:$0 sps:$4 sm:$0xff]  }
   0xa   :  { %1241 = vmatmul.mubr.msk.bf16.vlgmr.msra.gmra.mxu0 %vm210_vm1, %v1348_v3  ;;  %1293 = vmatmul.mubr.msk.bf16.vlgmr.msra.gmra.mxu1 %vm210_vm1, %v1349_v4  ;;  %v1372_v27 = vld [vmem:[%s1685_s0 + $0x60] sm:$0xff]  }
   0xb   :  { %1244 = vmatprep.mubr.msk.bf16.mxu0 %vm1374_vm0, %v1373_v0  ;;  %1296 = vmatprep.mubr.msk.bf16.mxu1 %vm1374_vm0, %v1373_v0  ;;  %v1558_v28 = vld [vmem:[%s1686_s2] ss:$0 sm:$0xff] }
  0x12   :  { %1245 = vmatmul.mubr.msk.bf16.gmra.mxu0 %vm210_vm1, %v1350_v5  ;;  %1297 = vmatmul.mubr.msk.bf16.gmra.mxu1 %vm210_vm1, %v1351_v6 }
  0x13   :  { %1248 = vmatprep.mubr.msk.bf16.mxu0 %vm1374_vm0, %v1373_v0  ;;  %1300 = vmatprep.mubr.msk.bf16.mxu1 %vm1374_vm0, %v1373_v0 }
  0x1a   :  { %1249 = vmatmul.mubr.msk.bf16.gmra.mxu0 %vm210_vm1, %v1352_v7  ;;  %1301 = vmatmul.mubr.msk.bf16.gmra.mxu1 %vm210_vm1, %v1353_v8 }
  0x1b   :  { %1252 = vmatprep.mubr.msk.bf16.mxu0 %vm1374_vm0, %v1373_v0  ;;  %1304 = vmatprep.mubr.msk.bf16.mxu1 %vm1374_vm0, %v1373_v0 }
  0x22   :  { %1253 = vmatmul.mubr.msk.bf16.gmra.mxu0 %vm210_vm1, %v1354_v9  ;;  %1305 = vmatmul.mubr.msk.bf16.gmra.mxu1 %vm210_vm1, %v1355_v10 }
  0x23   :  { %1256 = vmatprep.mubr.msk.bf16.mxu0 %vm1374_vm0, %v1373_v0  ;;  %1308 = vmatprep.mubr.msk.bf16.mxu1 %vm1374_vm0, %v1373_v0 }
  0x2a   :  { %1257 = vmatmul.mubr.msk.bf16.gmra.mxu0 %vm210_vm1, %v1356_v11  ;;  %1309 = vmatmul.mubr.msk.bf16.gmra.mxu1 %vm210_vm1, %v1357_v12 }
  0x2b   :  { %1260 = vmatprep.mubr.msk.bf16.mxu0 %vm1374_vm0, %v1373_v0  ;;  %1312 = vmatprep.mubr.msk.bf16.mxu1 %vm1374_vm0, %v1373_v0 }
  0x32   :  { %1261 = vmatmul.mubr.msk.bf16.gmra.mxu0 %vm210_vm1, %v1358_v13  ;;  %1313 = vmatmul.mubr.msk.bf16.gmra.mxu1 %vm210_vm1, %v1359_v14 }
  0x33   :  { %1264 = vmatprep.mubr.msk.bf16.mxu0 %vm1374_vm0, %v1373_v0  ;;  %1316 = vmatprep.mubr.msk.bf16.mxu1 %vm1374_vm0, %v1373_v0 }
  0x3a   :  { %1265 = vmatmul.mubr.msk.bf16.gmra.mxu0 %vm210_vm1, %v1360_v15  ;;  %1317 = vmatmul.mubr.msk.bf16.gmra.mxu1 %vm210_vm1, %v1361_v16 }
  0x3b   :  { %1268 = vmatprep.mubr.msk.bf16.mxu0 %vm1374_vm0, %v1373_v0  ;;  %1320 = vmatprep.mubr.msk.bf16.mxu1 %vm1374_vm0, %v1373_v0 }
  0x42   :  { %1269 = vmatmul.mubr.msk.bf16.gmra.mxu0 %vm210_vm1, %v1362_v17  ;;  %1321 = vmatmul.mubr.msk.bf16.gmra.mxu1 %vm210_vm1, %v1363_v18 }
  0x43   :  { %1272 = vmatprep.mubr.msk.bf16.mxu0 %vm1374_vm0, %v1373_v0  ;;  %1324 = vmatprep.mubr.msk.bf16.mxu1 %vm1374_vm0, %v1373_v0 }
  0x4a   :  { %1273 = vmatmul.mubr.msk.bf16.gmra.mxu0 %vm210_vm1, %v1364_v19  ;;  %1325 = vmatmul.mubr.msk.bf16.gmra.mxu1 %vm210_vm1, %v1365_v20 }
  0x4b   :  { %1276 = vmatprep.mubr.msk.bf16.mxu0 %vm1374_vm0, %v1373_v0  ;;  %1328 = vmatprep.mubr.msk.bf16.mxu1 %vm1374_vm0, %v1373_v0 }
  0x52   :  { %1277 = vmatmul.mubr.msk.bf16.gmra.mxu0 %vm210_vm1, %v1366_v21  ;;  %1329 = vmatmul.mubr.msk.bf16.gmra.mxu1 %vm210_vm1, %v1367_v22 }
  0x53   :  { %1280 = vmatprep.mubr.msk.bf16.mxu0 %vm1374_vm0, %v1373_v0  ;;  %1332 = vmatprep.mubr.msk.bf16.mxu1 %vm1374_vm0, %v1373_v0 }
  0x5a   :  { %1281 = vmatmul.mubr.msk.bf16.gmra.mxu0 %vm210_vm1, %v1368_v23  ;;  %1333 = vmatmul.mubr.msk.bf16.gmra.mxu1 %vm210_vm1, %v1369_v24 }
  0x5b   :  { %1284 = vmatprep.mubr.msk.bf16.mxu0 %vm1374_vm0, %v1373_v0  ;;  %1336 = vmatprep.mubr.msk.bf16.mxu1 %vm1374_vm0, %v1373_v0 }
  0x62   :  { %1285 = vmatmul.mubr.msk.bf16.gmra.mxu0 %vm210_vm1, %v1370_v25  ;;  %1337 = vmatmul.mubr.msk.bf16.gmra.mxu1 %vm210_vm1, %v1371_v26 }
  0x63   :  { %1288 = vmatprep.mubr.msk.bf16.mxu0 %vm1374_vm0, %v1373_v0 }
  0x6a   :  { %1289 = vmatmul.mubr.msk.bf16.gmra.mxu0 %vm210_vm1, %v1372_v27 }
  0xca   :  { %v320_v29 = vpop.f32.mrf.mxu0  ;;  %v424_v30 = vpop.f32.mrf.mxu1 }
  0xcb   :  { %v321_v31 = vadd.f32 %v1558_v28, %v320_v29  ;;  %v425_v32 = vadd.f32 %v1558_v28, %v424_v30 }
  0xcc   :  { %v1242_v33 = vpop.f32.mrf.mxu0  ;;  %v1294_v34 = vpop.f32.mrf.mxu1 }
  0xcd   :  { %vm544_vm2 = vcmp.ge.f32.partialorder %v425_v32, 0.0  ;;  %v593_v35 = vmul.f32 0.2, %v425_v32  ;;  %v567_v36 = vmul.f32 0.2, %v321_v31  ;;  %vm518_vm3 = vcmp.ge.f32.partialorder %v321_v31, 0.0 }
  0xce   :  { %v323_v37 = vpop.f32.mrf.mxu0  ;;  %v427_v38 = vpop.f32.mrf.mxu1 }
  0xcf   :  { %v324_v39 = vadd.f32 %v1558_v28, %v323_v37  ;;  %v428_v40 = vadd.f32 %v1558_v28, %v427_v38  ;;  %v642_v42 = vsel %vm544_vm2, %v425_v32, %v593_v35  ;;  %v616_v46 = vsel %vm518_vm3, %v321_v31, %v567_v36 }
  0xd0   :  { %v1243_v41 = vpop.f32.mrf.mxu0  ;;  %v1295_v43 = vpop.f32.mrf.mxu1 }
  0xd1   :  { %vm519_vm4 = vcmp.ge.f32.partialorder %v324_v39, 0.0  ;;  %v568_v44 = vmul.f32 0.2, %v324_v39  ;;  %vm545_vm5 = vcmp.ge.f32.partialorder %v428_v40, 0.0  ;;  %v594_v45 = vmul.f32 0.2, %v428_v40 }
  0xd2   :  { %v328_v47 = vpop.f32.mrf.mxu0  ;;  %v432_v48 = vpop.f32.mrf.mxu1 }
  0xd3   :  { %v617_v49 = vsel %vm519_vm4, %v324_v39, %v568_v44  ;;  %v329_v50 = vadd.f32 %v1558_v28, %v328_v47  ;;  %v643_v51 = vsel %vm545_vm5, %v428_v40, %v594_v45  ;;  %v433_v52 = vadd.f32 %v1558_v28, %v432_v48 }
  0xd4   :  { %v1069_v53 = vpack.c.bf16 %v617_v49, %v616_v46  ;;  %v1246_v54 = vpop.f32.mrf.mxu0  ;;  %v1134_v55 = vpack.c.bf16 %v643_v51, %v642_v42  ;;  %v1298_v56 = vpop.f32.mrf.mxu1 }
  0xd5   :  { %vm546_vm6 = vcmp.ge.f32.partialorder %v433_v52, 0.0  ;;  %v595_v57 = vmul.f32 0.2, %v433_v52  ;;  %v569_v58 = vmul.f32 0.2, %v329_v50  ;;  %vm520_vm7 = vcmp.ge.f32.partialorder %v329_v50, 0.0 }
  0xd6   :  { %1070 = vst [vmem:[%s1687_s3] sm:$0xff] %v1069_v53   ;;  %1198 = vst [vmem:[%s1687_s3 + $0x68] sm:$0xff] %v1134_v55   ;;  %v331_v59 = vpop.f32.mrf.mxu0  ;;  %v435_v60 = vpop.f32.mrf.mxu1 }
  0xd7   :  { %v332_v61 = vadd.f32 %v1558_v28, %v331_v59  ;;  %v436_v62 = vadd.f32 %v1558_v28, %v435_v60  ;;  %v644_v0 = vsel %vm546_vm6, %v433_v52, %v595_v57  ;;  %v618_v4 = vsel %vm520_vm7, %v329_v50, %v569_v58 }
  0xd8   :  { %v1247_v63 = vpop.f32.mrf.mxu0  ;;  %v1299_v1 = vpop.f32.mrf.mxu1 }
  0xd9   :  { %vm521_vm8 = vcmp.ge.f32.partialorder %v332_v61, 0.0  ;;  %v570_v2 = vmul.f32 0.2, %v332_v61  ;;  %vm547_vm9 = vcmp.ge.f32.partialorder %v436_v62, 0.0  ;;  %v596_v3 = vmul.f32 0.2, %v436_v62 }
  0xda   :  { %v336_v5 = vpop.f32.mrf.mxu0  ;;  %v440_v6 = vpop.f32.mrf.mxu1 }
  0xdb   :  { %v619_v7 = vsel %vm521_vm8, %v332_v61, %v570_v2  ;;  %v337_v8 = vadd.f32 %v1558_v28, %v336_v5  ;;  %v645_v9 = vsel %vm547_vm9, %v436_v62, %v596_v3  ;;  %v441_v10 = vadd.f32 %v1558_v28, %v440_v6 }
  0xdc   :  { %v1074_v11 = vpack.c.bf16 %v619_v7, %v618_v4  ;;  %v1250_v12 = vpop.f32.mrf.mxu0  ;;  %v1139_v13 = vpack.c.bf16 %v645_v9, %v644_v0  ;;  %v1302_v14 = vpop.f32.mrf.mxu1 }
  0xdd   :  { %vm548_vm10 = vcmp.ge.f32.partialorder %v441_v10, 0.0  ;;  %v597_v15 = vmul.f32 0.2, %v441_v10  ;;  %v571_v16 = vmul.f32 0.2, %v337_v8  ;;  %vm522_vm11 = vcmp.ge.f32.partialorder %v337_v8, 0.0 }
  0xde   :  { %1186 = vst [vmem:[%s1687_s3 + $0x8] sm:$0xff] %v1074_v11   ;;  %1199 = vst [vmem:[%s1687_s3 + $0x70] sm:$0xff] %v1139_v13   ;;  %v339_v17 = vpop.f32.mrf.mxu0  ;;  %v443_v18 = vpop.f32.mrf.mxu1 }
  0xdf   :  { %v340_v19 = vadd.f32 %v1558_v28, %v339_v17  ;;  %v444_v20 = vadd.f32 %v1558_v28, %v443_v18  ;;  %v646_v22 = vsel %vm548_vm10, %v441_v10, %v597_v15  ;;  %v620_v26 = vsel %vm522_vm11, %v337_v8, %v571_v16 }
  0xe0   :  { %v1251_v21 = vpop.f32.mrf.mxu0  ;;  %v1303_v23 = vpop.f32.mrf.mxu1 }
  0xe1   :  { %vm523_vm12 = vcmp.ge.f32.partialorder %v340_v19, 0.0  ;;  %v572_v24 = vmul.f32 0.2, %v340_v19  ;;  %vm549_vm13 = vcmp.ge.f32.partialorder %v444_v20, 0.0  ;;  %v598_v25 = vmul.f32 0.2, %v444_v20 }
  0xe2   :  { %v344_v27 = vpop.f32.mrf.mxu0  ;;  %v448_v29 = vpop.f32.mrf.mxu1 }
  0xe3   :  { %v621_v30 = vsel %vm523_vm12, %v340_v19, %v572_v24  ;;  %v345_v31 = vadd.f32 %v1558_v28, %v344_v27  ;;  %v647_v32 = vsel %vm549_vm13, %v444_v20, %v598_v25  ;;  %v449_v33 = vadd.f32 %v1558_v28, %v448_v29 }
  0xe4   :  { %v1079_v34 = vpack.c.bf16 %v621_v30, %v620_v26  ;;  %v1254_v35 = vpop.f32.mrf.mxu0  ;;  %v1144_v36 = vpack.c.bf16 %v647_v32, %v646_v22  ;;  %v1306_v37 = vpop.f32.mrf.mxu1 }
  0xe5   :  { %vm550_vm14 = vcmp.ge.f32.partialorder %v449_v33, 0.0  ;;  %v599_v38 = vmul.f32 0.2, %v449_v33  ;;  %v573_v39 = vmul.f32 0.2, %v345_v31  ;;  %vm524_vm15 = vcmp.ge.f32.partialorder %v345_v31, 0.0 }
  0xe6   :  { %1187 = vst [vmem:[%s1687_s3 + $0x10] sm:$0xff] %v1079_v34   ;;  %1200 = vst [vmem:[%s1687_s3 + $0x78] sm:$0xff] %v1144_v36   ;;  %v347_v40 = vpop.f32.mrf.mxu0  ;;  %v451_v41 = vpop.f32.mrf.mxu1 }
  0xe7   :  { %v348_v42 = vadd.f32 %v1558_v28, %v347_v40  ;;  %v452_v43 = vadd.f32 %v1558_v28, %v451_v41  ;;  %v648_v45 = vsel %vm550_vm14, %v449_v33, %v599_v38  ;;  %v622_v49 = vsel %vm524_vm15, %v345_v31, %v573_v39 }
  0xe8   :  { %v1255_v44 = vpop.f32.mrf.mxu0  ;;  %v1307_v46 = vpop.f32.mrf.mxu1 }
  0xe9   :  { %vm525_vm0 = vcmp.ge.f32.partialorder %v348_v42, 0.0  ;;  %v574_v47 = vmul.f32 0.2, %v348_v42  ;;  %vm551_vm1 = vcmp.ge.f32.partialorder %v452_v43, 0.0  ;;  %v600_v48 = vmul.f32 0.2, %v452_v43 }
  0xea   :  { %v352_v50 = vpop.f32.mrf.mxu0  ;;  %v456_v51 = vpop.f32.mrf.mxu1 }
  0xeb   :  { %v623_v52 = vsel %vm525_vm0, %v348_v42, %v574_v47  ;;  %v353_v53 = vadd.f32 %v1558_v28, %v352_v50  ;;  %v649_v54 = vsel %vm551_vm1, %v452_v43, %v600_v48  ;;  %v457_v55 = vadd.f32 %v1558_v28, %v456_v51 }
  0xec   :  { %v1084_v56 = vpack.c.bf16 %v623_v52, %v622_v49  ;;  %v1258_v57 = vpop.f32.mrf.mxu0  ;;  %v1149_v58 = vpack.c.bf16 %v649_v54, %v648_v45  ;;  %v1310_v59 = vpop.f32.mrf.mxu1 }
  0xed   :  { %vm552_vm2 = vcmp.ge.f32.partialorder %v457_v55, 0.0  ;;  %v601_v60 = vmul.f32 0.2, %v457_v55  ;;  %v575_v61 = vmul.f32 0.2, %v353_v53  ;;  %vm526_vm3 = vcmp.ge.f32.partialorder %v353_v53, 0.0 }
  0xee   :  { %1188 = vst [vmem:[%s1687_s3 + $0x18] sm:$0xff] %v1084_v56   ;;  %1201 = vst [vmem:[%s1687_s3 + $0x80] sm:$0xff] %v1149_v58   ;;  %v355_v62 = vpop.f32.mrf.mxu0  ;;  %v459_v63 = vpop.f32.mrf.mxu1 }
  0xef   :  { %v356_v0 = vadd.f32 %v1558_v28, %v355_v62  ;;  %v460_v1 = vadd.f32 %v1558_v28, %v459_v63  ;;  %v650_v3 = vsel %vm552_vm2, %v457_v55, %v601_v60  ;;  %v624_v7 = vsel %vm526_vm3, %v353_v53, %v575_v61 }
  0xf0   :  { %v1259_v2 = vpop.f32.mrf.mxu0  ;;  %v1311_v4 = vpop.f32.mrf.mxu1 }
  0xf1   :  { %vm527_vm4 = vcmp.ge.f32.partialorder %v356_v0, 0.0  ;;  %v576_v5 = vmul.f32 0.2, %v356_v0  ;;  %vm553_vm5 = vcmp.ge.f32.partialorder %v460_v1, 0.0  ;;  %v602_v6 = vmul.f32 0.2, %v460_v1 }
  0xf2   :  { %v360_v8 = vpop.f32.mrf.mxu0  ;;  %v464_v9 = vpop.f32.mrf.mxu1 }
  0xf3   :  { %v625_v10 = vsel %vm527_vm4, %v356_v0, %v576_v5  ;;  %v361_v11 = vadd.f32 %v1558_v28, %v360_v8  ;;  %v651_v12 = vsel %vm553_vm5, %v460_v1, %v602_v6  ;;  %v465_v13 = vadd.f32 %v1558_v28, %v464_v9 }
  0xf4   :  { %v1089_v14 = vpack.c.bf16 %v625_v10, %v624_v7  ;;  %v1262_v15 = vpop.f32.mrf.mxu0  ;;  %v1154_v16 = vpack.c.bf16 %v651_v12, %v650_v3  ;;  %v1314_v17 = vpop.f32.mrf.mxu1 }
  0xf5   :  { %vm554_vm6 = vcmp.ge.f32.partialorder %v465_v13, 0.0  ;;  %v603_v18 = vmul.f32 0.2, %v465_v13  ;;  %v577_v19 = vmul.f32 0.2, %v361_v11  ;;  %vm528_vm7 = vcmp.ge.f32.partialorder %v361_v11, 0.0 }
  0xf6   :  { %1189 = vst [vmem:[%s1687_s3 + $0x20] sm:$0xff] %v1089_v14   ;;  %1202 = vst [vmem:[%s1687_s3 + $0x88] sm:$0xff] %v1154_v16   ;;  %v363_v20 = vpop.f32.mrf.mxu0  ;;  %v467_v21 = vpop.f32.mrf.mxu1 }
  0xf7   :  { %v364_v22 = vadd.f32 %v1558_v28, %v363_v20  ;;  %v468_v23 = vadd.f32 %v1558_v28, %v467_v21  ;;  %v652_v25 = vsel %vm554_vm6, %v465_v13, %v603_v18  ;;  %v626_v30 = vsel %vm528_vm7, %v361_v11, %v577_v19 }
  0xf8   :  { %v1263_v24 = vpop.f32.mrf.mxu0  ;;  %v1315_v26 = vpop.f32.mrf.mxu1 }
  0xf9   :  { %vm529_vm8 = vcmp.ge.f32.partialorder %v364_v22, 0.0  ;;  %v578_v27 = vmul.f32 0.2, %v364_v22  ;;  %vm555_vm9 = vcmp.ge.f32.partialorder %v468_v23, 0.0  ;;  %v604_v29 = vmul.f32 0.2, %v468_v23 }
  0xfa   :  { %v368_v31 = vpop.f32.mrf.mxu0  ;;  %v472_v32 = vpop.f32.mrf.mxu1 }
  0xfb   :  { %v627_v33 = vsel %vm529_vm8, %v364_v22, %v578_v27  ;;  %v369_v34 = vadd.f32 %v1558_v28, %v368_v31  ;;  %v653_v35 = vsel %vm555_vm9, %v468_v23, %v604_v29  ;;  %v473_v36 = vadd.f32 %v1558_v28, %v472_v32 }
  0xfc   :  { %v1094_v37 = vpack.c.bf16 %v627_v33, %v626_v30  ;;  %v1266_v38 = vpop.f32.mrf.mxu0  ;;  %v1159_v39 = vpack.c.bf16 %v653_v35, %v652_v25  ;;  %v1318_v40 = vpop.f32.mrf.mxu1 }
  0xfd   :  { %vm556_vm10 = vcmp.ge.f32.partialorder %v473_v36, 0.0  ;;  %v605_v41 = vmul.f32 0.2, %v473_v36  ;;  %v579_v42 = vmul.f32 0.2, %v369_v34  ;;  %vm530_vm11 = vcmp.ge.f32.partialorder %v369_v34, 0.0 }
  0xfe   :  { %1190 = vst [vmem:[%s1687_s3 + $0x28] sm:$0xff] %v1094_v37   ;;  %1203 = vst [vmem:[%s1687_s3 + $0x90] sm:$0xff] %v1159_v39   ;;  %v371_v43 = vpop.f32.mrf.mxu0  ;;  %v475_v44 = vpop.f32.mrf.mxu1 }
  0xff   :  { %v372_v45 = vadd.f32 %v1558_v28, %v371_v43  ;;  %v476_v46 = vadd.f32 %v1558_v28, %v475_v44  ;;  %v654_v48 = vsel %vm556_vm10, %v473_v36, %v605_v41  ;;  %v628_v52 = vsel %vm530_vm11, %v369_v34, %v579_v42 }
 0x100   :  { %v1267_v47 = vpop.f32.mrf.mxu0  ;;  %v1319_v49 = vpop.f32.mrf.mxu1 }
 0x101   :  { %vm531_vm12 = vcmp.ge.f32.partialorder %v372_v45, 0.0  ;;  %v580_v50 = vmul.f32 0.2, %v372_v45  ;;  %vm557_vm13 = vcmp.ge.f32.partialorder %v476_v46, 0.0  ;;  %v606_v51 = vmul.f32 0.2, %v476_v46 }
 0x102   :  { %v376_v53 = vpop.f32.mrf.mxu0  ;;  %v480_v54 = vpop.f32.mrf.mxu1 }
 0x103   :  { %v629_v55 = vsel %vm531_vm12, %v372_v45, %v580_v50  ;;  %v377_v56 = vadd.f32 %v1558_v28, %v376_v53  ;;  %v655_v57 = vsel %vm557_vm13, %v476_v46, %v606_v51  ;;  %v481_v58 = vadd.f32 %v1558_v28, %v480_v54 }
 0x104   :  { %v1099_v59 = vpack.c.bf16 %v629_v55, %v628_v52  ;;  %v1270_v60 = vpop.f32.mrf.mxu0  ;;  %v1164_v61 = vpack.c.bf16 %v655_v57, %v654_v48  ;;  %v1322_v62 = vpop.f32.mrf.mxu1 }
 0x105   :  { %vm558_vm14 = vcmp.ge.f32.partialorder %v481_v58, 0.0  ;;  %v607_v63 = vmul.f32 0.2, %v481_v58  ;;  %v581_v0 = vmul.f32 0.2, %v377_v56  ;;  %vm532_vm15 = vcmp.ge.f32.partialorder %v377_v56, 0.0 }
 0x106   :  { %1191 = vst [vmem:[%s1687_s3 + $0x30] sm:$0xff] %v1099_v59   ;;  %1204 = vst [vmem:[%s1687_s3 + $0x98] sm:$0xff] %v1164_v61   ;;  %v379_v1 = vpop.f32.mrf.mxu0  ;;  %v483_v2 = vpop.f32.mrf.mxu1 }
 0x107   :  { %v380_v3 = vadd.f32 %v1558_v28, %v379_v1  ;;  %v484_v4 = vadd.f32 %v1558_v28, %v483_v2  ;;  %v656_v6 = vsel %vm558_vm14, %v481_v58, %v607_v63  ;;  %v630_v10 = vsel %vm532_vm15, %v377_v56, %v581_v0 }
 0x108   :  { %v1271_v5 = vpop.f32.mrf.mxu0  ;;  %v1323_v7 = vpop.f32.mrf.mxu1 }
 0x109   :  { %vm533_vm0 = vcmp.ge.f32.partialorder %v380_v3, 0.0  ;;  %v582_v8 = vmul.f32 0.2, %v380_v3  ;;  %vm559_vm1 = vcmp.ge.f32.partialorder %v484_v4, 0.0  ;;  %v608_v9 = vmul.f32 0.2, %v484_v4 }
 0x10a   :  { %v384_v11 = vpop.f32.mrf.mxu0  ;;  %v488_v12 = vpop.f32.mrf.mxu1 }
 0x10b   :  { %v631_v13 = vsel %vm533_vm0, %v380_v3, %v582_v8  ;;  %v385_v14 = vadd.f32 %v1558_v28, %v384_v11  ;;  %v657_v15 = vsel %vm559_vm1, %v484_v4, %v608_v9  ;;  %v489_v16 = vadd.f32 %v1558_v28, %v488_v12 }
 0x10c   :  { %v1104_v17 = vpack.c.bf16 %v631_v13, %v630_v10  ;;  %v1274_v18 = vpop.f32.mrf.mxu0  ;;  %v1169_v19 = vpack.c.bf16 %v657_v15, %v656_v6  ;;  %v1326_v20 = vpop.f32.mrf.mxu1 }
 0x10d   :  { %vm560_vm2 = vcmp.ge.f32.partialorder %v489_v16, 0.0  ;;  %v609_v21 = vmul.f32 0.2, %v489_v16  ;;  %v583_v22 = vmul.f32 0.2, %v385_v14  ;;  %vm534_vm3 = vcmp.ge.f32.partialorder %v385_v14, 0.0 }
 0x10e   :  { %1192 = vst [vmem:[%s1687_s3 + $0x38] sm:$0xff] %v1104_v17   ;;  %1205 = vst [vmem:[%s1687_s3 + $0xa0] sm:$0xff] %v1169_v19   ;;  %v387_v23 = vpop.f32.mrf.mxu0  ;;  %v491_v24 = vpop.f32.mrf.mxu1 }
 0x10f   :  { %v388_v25 = vadd.f32 %v1558_v28, %v387_v23  ;;  %v492_v26 = vadd.f32 %v1558_v28, %v491_v24  ;;  %v658_v29 = vsel %vm560_vm2, %v489_v16, %v609_v21  ;;  %v632_v33 = vsel %vm534_vm3, %v385_v14, %v583_v22 }
 0x110   :  { %v1275_v27 = vpop.f32.mrf.mxu0  ;;  %v1327_v30 = vpop.f32.mrf.mxu1 }
 0x111   :  { %vm535_vm4 = vcmp.ge.f32.partialorder %v388_v25, 0.0  ;;  %v584_v31 = vmul.f32 0.2, %v388_v25  ;;  %vm561_vm5 = vcmp.ge.f32.partialorder %v492_v26, 0.0  ;;  %v610_v32 = vmul.f32 0.2, %v492_v26 }
 0x112   :  { %v392_v34 = vpop.f32.mrf.mxu0  ;;  %v496_v35 = vpop.f32.mrf.mxu1 }
 0x113   :  { %v633_v36 = vsel %vm535_vm4, %v388_v25, %v584_v31  ;;  %v393_v37 = vadd.f32 %v1558_v28, %v392_v34  ;;  %v659_v38 = vsel %vm561_vm5, %v492_v26, %v610_v32  ;;  %v497_v39 = vadd.f32 %v1558_v28, %v496_v35 }
 0x114   :  { %v1109_v40 = vpack.c.bf16 %v633_v36, %v632_v33  ;;  %v1278_v41 = vpop.f32.mrf.mxu0  ;;  %v1174_v42 = vpack.c.bf16 %v659_v38, %v658_v29  ;;  %v1330_v43 = vpop.f32.mrf.mxu1 }
 0x115   :  { %vm562_vm6 = vcmp.ge.f32.partialorder %v497_v39, 0.0  ;;  %v611_v44 = vmul.f32 0.2, %v497_v39  ;;  %v585_v45 = vmul.f32 0.2, %v393_v37  ;;  %vm536_vm7 = vcmp.ge.f32.partialorder %v393_v37, 0.0 }
 0x116   :  { %1193 = vst [vmem:[%s1687_s3 + $0x40] sm:$0xff] %v1109_v40   ;;  %1206 = vst [vmem:[%s1687_s3 + $0xa8] sm:$0xff] %v1174_v42   ;;  %v395_v46 = vpop.f32.mrf.mxu0  ;;  %v499_v47 = vpop.f32.mrf.mxu1 }
 0x117   :  { %v396_v48 = vadd.f32 %v1558_v28, %v395_v46  ;;  %v500_v49 = vadd.f32 %v1558_v28, %v499_v47  ;;  %v660_v51 = vsel %vm562_vm6, %v497_v39, %v611_v44  ;;  %v634_v55 = vsel %vm536_vm7, %v393_v37, %v585_v45 }
 0x118   :  { %v1279_v50 = vpop.f32.mrf.mxu0  ;;  %v1331_v52 = vpop.f32.mrf.mxu1 }
 0x119   :  { %vm537_vm8 = vcmp.ge.f32.partialorder %v396_v48, 0.0  ;;  %v586_v53 = vmul.f32 0.2, %v396_v48  ;;  %vm563_vm9 = vcmp.ge.f32.partialorder %v500_v49, 0.0  ;;  %v612_v54 = vmul.f32 0.2, %v500_v49 }
 0x11a   :  { %v400_v56 = vpop.f32.mrf.mxu0  ;;  %v504_v57 = vpop.f32.mrf.mxu1 }
 0x11b   :  { %v635_v58 = vsel %vm537_vm8, %v396_v48, %v586_v53  ;;  %v401_v59 = vadd.f32 %v1558_v28, %v400_v56  ;;  %v661_v60 = vsel %vm563_vm9, %v500_v49, %v612_v54  ;;  %v505_v61 = vadd.f32 %v1558_v28, %v504_v57 }
 0x11c   :  { %v1114_v62 = vpack.c.bf16 %v635_v58, %v634_v55  ;;  %v1282_v63 = vpop.f32.mrf.mxu0  ;;  %v1179_v0 = vpack.c.bf16 %v661_v60, %v660_v51  ;;  %v1334_v1 = vpop.f32.mrf.mxu1 }
 0x11d   :  { %vm564_vm10 = vcmp.ge.f32.partialorder %v505_v61, 0.0  ;;  %v613_v2 = vmul.f32 0.2, %v505_v61  ;;  %v587_v3 = vmul.f32 0.2, %v401_v59  ;;  %vm538_vm11 = vcmp.ge.f32.partialorder %v401_v59, 0.0 }
 0x11e   :  { %1194 = vst [vmem:[%s1687_s3 + $0x48] sm:$0xff] %v1114_v62   ;;  %1207 = vst [vmem:[%s1687_s3 + $0xb0] sm:$0xff] %v1179_v0   ;;  %v403_v4 = vpop.f32.mrf.mxu0  ;;  %v507_v5 = vpop.f32.mrf.mxu1 }
 0x11f   :  { %v404_v6 = vadd.f32 %v1558_v28, %v403_v4  ;;  %v508_v7 = vadd.f32 %v1558_v28, %v507_v5  ;;  %v662_v9 = vsel %vm564_vm10, %v505_v61, %v613_v2  ;;  %v636_v13 = vsel %vm538_vm11, %v401_v59, %v587_v3 }
 0x120   :  { %v1283_v8 = vpop.f32.mrf.mxu0  ;;  %v1335_v10 = vpop.f32.mrf.mxu1 }
 0x121   :  { %vm539_vm12 = vcmp.ge.f32.partialorder %v404_v6, 0.0  ;;  %v588_v11 = vmul.f32 0.2, %v404_v6  ;;  %vm565_vm13 = vcmp.ge.f32.partialorder %v508_v7, 0.0  ;;  %v614_v12 = vmul.f32 0.2, %v508_v7 }
 0x122   :  { %v408_v14 = vpop.f32.mrf.mxu0  ;;  %v512_v15 = vpop.f32.mrf.mxu1 }
 0x123   :  { %v637_v16 = vsel %vm539_vm12, %v404_v6, %v588_v11  ;;  %v409_v17 = vadd.f32 %v1558_v28, %v408_v14  ;;  %v663_v18 = vsel %vm565_vm13, %v508_v7, %v614_v12  ;;  %v513_v19 = vadd.f32 %v1558_v28, %v512_v15 }
 0x124   :  { %v1119_v20 = vpack.c.bf16 %v637_v16, %v636_v13  ;;  %v1286_v21 = vpop.f32.mrf.mxu0  ;;  %v1184_v22 = vpack.c.bf16 %v663_v18, %v662_v9  ;;  %v1338_v23 = vpop.f32.mrf.mxu1 }
 0x125   :  { %vm566_vm14 = vcmp.ge.f32.partialorder %v513_v19, 0.0  ;;  %v615_v24 = vmul.f32 0.2, %v513_v19  ;;  %v589_v27 = vmul.f32 0.2, %v409_v17  ;;  %vm540_vm15 = vcmp.ge.f32.partialorder %v409_v17, 0.0 }
 0x126   :  { %1195 = vst [vmem:[%s1687_s3 + $0x50] sm:$0xff] %v1119_v20   ;;  %1208 = vst [vmem:[%s1687_s3 + $0xb8] sm:$0xff] %v1184_v22   ;;  %v411_v25 = vpop.f32.mrf.mxu0  ;;  %v515_v26 = vpop.f32.mrf.mxu1 }
 0x127   :  { %v412_v29 = vadd.f32 %v1558_v28, %v411_v25  ;;  %v664_v30 = vsel %vm566_vm14, %v513_v19, %v615_v24  ;;  %v638_v36 = vsel %vm540_vm15, %v409_v17, %v589_v27 }
 0x128   :  { %v1287_v31 = vpop.f32.mrf.mxu0  ;;  %v1065_v32 = vpack.c.bf16 %v664_v30, %v664_v30  ;;  %v1339_v33 = vpop.f32.mrf.mxu1 }
 0x129   :  { %vm541_vm0 = vcmp.ge.f32.partialorder %v412_v29, 0.0  ;;  %v590_v34 = vmul.f32 0.2, %v412_v29 }
 0x12a   :  { %910 = vst [vmem:[%s1687_s3 + $0xc0] sm:$0xf] %v1065_v32  ;;  %v416_v35 = vpop.f32.mrf.mxu0 }
 0x12b   :  { %v639_v37 = vsel %vm541_vm0, %v412_v29, %v590_v34  ;;  %v417_v38 = vadd.f32 %v1558_v28, %v416_v35 }
 0x12c   :  { %v1124_v39 = vpack.c.bf16 %v639_v37, %v638_v36  ;;  %v1290_v40 = vpop.f32.mrf.mxu0 }
 0x12d   :  { %v591_v42 = vmul.f32 0.2, %v417_v38  ;;  %vm542_vm1 = vcmp.ge.f32.partialorder %v417_v38, 0.0 }
 0x12e   :  { %1196 = vst [vmem:[%s1687_s3 + $0x58] sm:$0xff] %v1124_v39   ;;  %v419_v41 = vpop.f32.mrf.mxu0 }
 0x12f   :  { %v420_v43 = vadd.f32 %v1558_v28, %v419_v41  ;;  %v640_v46 = vsel %vm542_vm1, %v417_v38, %v591_v42 }
 0x130   :  { %v1291_v44 = vpop.f32.mrf.mxu0 }
 0x131   :  { %vm543_vm2 = vcmp.ge.f32.partialorder %v420_v43, 0.0  ;;  %v592_v45 = vmul.f32 0.2, %v420_v43 }
 0x133   :  { %v641_v47 = vsel %vm543_vm2, %v420_v43, %v592_v45 }
 0x134   :  { %v1129_v48 = vpack.c.bf16 %v641_v47, %v640_v46 }
 0x136   :  { %1197 = vst [vmem:[%s1687_s3 + $0x60] sm:$0xff] %v1129_v48  }

// kernel: cnn_discriminator_forward.4
= control target key start
LH: loop header
LB: loop body
LE: loop exit
PB: predicated region body
PF: predicated region fallthrough
CT: control target
= control target key end

     0   :  { %s2356_s1 = inlined_call_operand.vmem [shape: bf16[1024,128], index: 1, kind: input, shape index: {}]   ;;  %s2357_s0 = inlined_call_operand.vmem [shape: bf16[104,1024], index: 0, kind: input, shape index: {}]   ;;  %s2358_s4 = inlined_call_operand.vmem [shape: f32[1,128], index: 4, kind: output, shape index: {1}]   ;;  %s2359_s5 = inlined_call_operand.vmem [shape: f32[1,128], index: 5, kind: output, shape index: {2}]   ;;  %s2360_s2 = inlined_call_operand.vmem [shape: f32[1,128], index: 2, kind: input, shape index: {}]   ;;  %s2361_s3 = inlined_call_operand.vmem [shape: f32[104,128], index: 3, kind: output, shape index: {0}]  }
   0x1   :  { %v1662_v0 = vld [vmem:[%s2356_s1 + $0x78] sm:$0xff]   ;;  %v1666_v4 = vld [vmem:[%s2356_s1 + $0x70] sm:$0xff]   ;;  %v1670_v8 = vld [vmem:[%s2356_s1 + $0x68] sm:$0xff]  }
   0x2   :  { %v1663_v1 = vld [vmem:[%s2356_s1 + $0xf8] sm:$0xff]   ;;  %1429 = vmatprep.subr.bf16.mxu0 %v1662_v0  ;;  %v1667_v5 = vld [vmem:[%s2356_s1 + $0xf0] sm:$0xff]   ;;  %v1671_v9 = vld [vmem:[%s2356_s1 + $0xe8] sm:$0xff]  }
   0x3   :  { %v1664_v2 = vld [vmem:[%s2356_s1 + $0x38] sm:$0xff]   ;;  %1487 = vmatprep.subr.bf16.mxu1 %v1663_v1  ;;  %v1668_v6 = vld [vmem:[%s2356_s1 + $0x30] sm:$0xff]   ;;  %v1672_v10 = vld [vmem:[%s2356_s1 + $0x28] sm:$0xff]  }
   0x4   :  { %v1665_v3 = vld [vmem:[%s2356_s1 + $0xb8] sm:$0xff]   ;;  %1430 = vmatpush3.bf16.msra.mxu0 %v1664_v2  ;;  %v1669_v7 = vld [vmem:[%s2356_s1 + $0xb0] sm:$0xff]   ;;  %v1673_v11 = vld [vmem:[%s2356_s1 + $0xa8] sm:$0xff]  }
   0x5   :  { %1488 = vmatpush3.bf16.msra.mxu1 %v1665_v3  ;;  %1431 = vmatprep.subr.bf16.mxu0 %v1666_v4  ;;  %v1674_v12 = vld [vmem:[%s2356_s1 + $0x60] sm:$0xff]   ;;  %v1678_v16 = vld [vmem:[%s2356_s1 + $0x58] sm:$0xff]   ;;  %v1682_v20 = vld [vmem:[%s2356_s1 + $0x50] sm:$0xff]  }
   0x6   :  { %1489 = vmatprep.subr.bf16.mxu1 %v1667_v5  ;;  %v1675_v13 = vld [vmem:[%s2356_s1 + $0xe0] sm:$0xff]   ;;  %v1679_v17 = vld [vmem:[%s2356_s1 + $0xd8] sm:$0xff]   ;;  %v1683_v21 = vld [vmem:[%s2356_s1 + $0xd0] sm:$0xff]  }
   0x7   :  { %v1676_v14 = vld [vmem:[%s2356_s1 + $0x20] sm:$0xff]   ;;  %v1680_v18 = vld [vmem:[%s2356_s1 + $0x18] sm:$0xff]   ;;  %v1684_v22 = vld [vmem:[%s2356_s1 + $0x10] sm:$0xff]  }
   0x8   :  { %1432 = vmatpush3.bf16.msra.mxu0 %v1668_v6  ;;  %v1677_v15 = vld [vmem:[%s2356_s1 + $0xa0] sm:$0xff]   ;;  %v1681_v19 = vld [vmem:[%s2356_s1 + $0x98] sm:$0xff]   ;;  %v1685_v23 = vld [vmem:[%s2356_s1 + $0x90] sm:$0xff]  }
   0x9   :  { %1490 = vmatpush3.bf16.msra.mxu1 %v1669_v7  ;;  %1433 = vmatprep.subr.bf16.mxu0 %v1670_v8  ;;  %v1686_v24 = vld [vmem:[%s2356_s1 + $0x48] sm:$0xff]   ;;  %v1690_v28 = vld [vmem:[%s2356_s1 + $0x40] sm:$0xff]   ;;  %v1694_v40 = vld [vmem:[%s2356_s1 + $0x178] sm:$0xff]  }
   0xa   :  { %1491 = vmatprep.subr.bf16.mxu1 %v1671_v9  ;;  %v1687_v25 = vld [vmem:[%s2356_s1 + $0xc8] sm:$0xff]   ;;  %v1691_v29 = vld [vmem:[%s2356_s1 + $0xc0] sm:$0xff]   ;;  %v1695_v41 = vld [vmem:[%s2356_s1 + $0x138] sm:$0xff]  }
   0xb   :  { %v1688_v26 = vld [vmem:[%s2356_s1 + $0x8] sm:$0xff]   ;;  %v1692_v30 = vld [vmem:[%s2356_s1] sm:$0xff]   ;;  %v1696_v42 = vld [vmem:[%s2356_s1 + $0x1f8] sm:$0xff]  }
   0xc   :  { %1434 = vmatpush3.bf16.msra.mxu0 %v1672_v10  ;;  %v1689_v27 = vld [vmem:[%s2356_s1 + $0x88] sm:$0xff]   ;;  %v1693_v31 = vld [vmem:[%s2356_s1 + $0x80] sm:$0xff]   ;;  %v1697_v43 = vld [vmem:[%s2356_s1 + $0x1b8] sm:$0xff]  }
   0xd   :  { %1492 = vmatpush3.bf16.msra.mxu1 %v1673_v11  ;;  %1435 = vmatprep.subr.bf16.mxu0 %v1674_v12  ;;  %v18_v32 = vld [vmem:[%s2357_s0] sm:$0xff]  ;;  %v19_v34 = vld [vmem:[%s2357_s0 + $0x8] sm:$0xff]  ;;  %v1698_v50 = vld [vmem:[%s2356_s1 + $0x170] sm:$0xff]  }
   0xe   :  { %1493 = vmatprep.subr.bf16.mxu1 %v1675_v13  ;;  %v22_v33 = vld [vmem:[%s2357_s0 + $0x20] sm:$0xff]  ;;  %v23_v37 = vld [vmem:[%s2357_s0 + $0x28] sm:$0xff]  ;;  %v1699_v52 = vld [vmem:[%s2356_s1 + $0x130] sm:$0xff]  }
   0xf   :  { %v1308_v35 = vcombine.low %v18_v32, %v22_v33  ;;  %v1309_v36 = vcombine.high %v18_v32, %v22_v33  ;;  %v1310_v38 = vcombine.low %v19_v34, %v23_v37  ;;  %v1311_v39 = vcombine.high %v19_v34, %v23_v37  ;;  %v26_v44 = vld [vmem:[%s2357_s0 + $0x40] sm:$0xff]  ;;  %v27_v47 = vld [vmem:[%s2357_s0 + $0x48] sm:$0xff]  ;;  %v1700_v54 = vld [vmem:[%s2356_s1 + $0x1f0] sm:$0xff]  }
  0x10   :  { %1436 = vmatpush3.bf16.msra.mxu0 %v1676_v14  ;;  %v30_v45 = vld [vmem:[%s2357_s0 + $0x60] sm:$0xff]  ;;  %v31_v48 = vld [vmem:[%s2357_s0 + $0x68] sm:$0xff]  ;;  %v1701_v55 = vld [vmem:[%s2356_s1 + $0x1b0] sm:$0xff]  }
  0x11   :  { %1494 = vmatpush3.bf16.msra.mxu1 %v1677_v15  ;;  %1437 = vmatprep.subr.bf16.mxu0 %v1678_v16  ;;  %v1317_v46 = vcombine.high %v26_v44, %v30_v45  ;;  %v1319_v49 = vcombine.high %v27_v47, %v31_v48  ;;  %v1316_v51 = vcombine.low %v26_v44, %v30_v45  ;;  %v1702_v56 = vld [vmem:[%s2356_s1 + $0x168] sm:$0xff]   ;;  %v34_v57 = vld [vmem:[%s2357_s0 + $0x80] sm:$0xff]  ;;  %v1710_v14 = vld [vmem:[%s2356_s1 + $0x158] sm:$0xff]  }
  0x12   :  { %1495 = vmatprep.subr.bf16.mxu1 %v1679_v17  ;;  %882 = vmatprep.mubr.bf16.mxu0 %v1309_v36  ;;  %v1318_v53 = vcombine.low %v27_v47, %v31_v48  ;;  %v38_v58 = vld [vmem:[%s2357_s0 + $0xa0] sm:$0xff]  ;;  %v35_v59 = vld [vmem:[%s2357_s0 + $0x88] sm:$0xff]  ;;  %v1711_v15 = vld [vmem:[%s2356_s1 + $0x118] sm:$0xff]  }
  0x13   :  { %970 = vmatprep.mubr.bf16.mxu1 %v1311_v39  ;;  %v39_v60 = vld [vmem:[%s2357_s0 + $0xa8] sm:$0xff]  ;;  %v1325_v61 = vcombine.high %v34_v57, %v38_v58  ;;  %v1324_v2 = vcombine.low %v34_v57, %v38_v58  ;;  %v1706_v3 = vld [vmem:[%s2356_s1 + $0x160] sm:$0xff]   ;;  %v1712_v17 = vld [vmem:[%s2356_s1 + $0x1d8] sm:$0xff]  }
  0x14   :  { %1438 = vmatpush3.bf16.msra.mxu0 %v1680_v18  ;;  %v1327_v62 = vcombine.high %v35_v59, %v39_v60  ;;  %v1703_v63 = vld [vmem:[%s2356_s1 + $0x128] sm:$0xff]   ;;  %v1326_v4 = vcombine.low %v35_v59, %v39_v60  ;;  %v1707_v5 = vld [vmem:[%s2356_s1 + $0x120] sm:$0xff]   ;;  %v28_v60 = vld [vmem:[%s2357_s0 + $0x50] sm:$0xff] }
  0x15   :  { %1496 = vmatpush3.bf16.msra.mxu1 %v1681_v19  ;;  %1439 = vmatprep.subr.bf16.mxu0 %v1682_v20  ;;  %v1704_v0 = vld [vmem:[%s2356_s1 + $0x1e8] sm:$0xff]   ;;  %v42_v6 = vld [vmem:[%s2357_s0 + $0xc0] sm:$0xff] }
  0x16   :  { %1497 = vmatprep.subr.bf16.mxu1 %v1683_v21  ;;  %v1705_v1 = vld [vmem:[%s2356_s1 + $0x1a8] sm:$0xff]   ;;  %v46_v7 = vld [vmem:[%s2357_s0 + $0xe0] sm:$0xff] }
  0x17   :  { %v43_v8 = vld [vmem:[%s2357_s0 + $0xc8] sm:$0xff]  ;;  %v1333_v9 = vcombine.high %v42_v6, %v46_v7  ;;  %v1708_v12 = vld [vmem:[%s2356_s1 + $0x1e0] sm:$0xff]   ;;  %v1332_v16 = vcombine.low %v42_v6, %v46_v7  ;;  %v37_v6 = vld [vmem:[%s2357_s0 + $0x98] sm:$0xff] }
  0x18   :  { %1440 = vmatpush3.bf16.msra.mxu0 %v1684_v22  ;;  %v47_v10 = vld [vmem:[%s2357_s0 + $0xe8] sm:$0xff]  ;;  %v1709_v13 = vld [vmem:[%s2356_s1 + $0x1a0] sm:$0xff]   ;;  %v41_v7 = vld [vmem:[%s2357_s0 + $0xb8] sm:$0xff] }
  0x19   :  { %1498 = vmatpush3.bf16.msra.mxu1 %v1685_v23  ;;  %1441 = vmatprep.subr.bf16.mxu0 %v1686_v24  ;;  %v1335_v11 = vcombine.high %v43_v8, %v47_v10  ;;  %v50_v18 = vld [vmem:[%s2357_s0 + $0x100] sm:$0xff]  ;;  %v1334_v20 = vcombine.low %v43_v8, %v47_v10  ;;  %v51_v22 = vld [vmem:[%s2357_s0 + $0x108] sm:$0xff] }
  0x1a   :  { %1499 = vmatprep.subr.bf16.mxu1 %v1687_v25  ;;  %v54_v19 = vld [vmem:[%s2357_s0 + $0x120] sm:$0xff]  ;;  %v55_v23 = vld [vmem:[%s2357_s0 + $0x128] sm:$0xff]  ;;  %v1713_v25 = vld [vmem:[%s2356_s1 + $0x198] sm:$0xff]  }
  0x1b   :  { %v1341_v21 = vcombine.high %v50_v18, %v54_v19  ;;  %v1343_v24 = vcombine.high %v51_v22, %v55_v23  ;;  %v59_v32 = vld [vmem:[%s2357_s0 + $0x148] sm:$0xff]  ;;  %v1340_v34 = vcombine.low %v50_v18, %v54_v19  ;;  %v1342_v36 = vcombine.low %v51_v22, %v55_v23  ;;  %v1726_v44 = vld [vmem:[%s2356_s1 + $0x140] sm:$0xff]   ;;  %v53_v22 = vld [vmem:[%s2357_s0 + $0x118] sm:$0xff] }
  0x1c   :  { %1442 = vmatpush3.bf16.msra.mxu0 %v1688_v26  ;;  %v1714_v26 = vld [vmem:[%s2356_s1 + $0x150] sm:$0xff]   ;;  %v63_v33 = vld [vmem:[%s2357_s0 + $0x168] sm:$0xff]  ;;  %v1727_v45 = vld [vmem:[%s2356_s1 + $0x100] sm:$0xff]  }
  0x1d   :  { %1500 = vmatpush3.bf16.msra.mxu1 %v1689_v27  ;;  %1443 = vmatprep.subr.bf16.mxu0 %v1690_v28  ;;  %v1715_v27 = vld [vmem:[%s2356_s1 + $0x110] sm:$0xff]   ;;  %v1351_v39 = vcombine.high %v59_v32, %v63_v33  ;;  %v1729_v48 = vld [vmem:[%s2356_s1 + $0x180] sm:$0xff]   ;;  %v57_v23 = vld [vmem:[%s2357_s0 + $0x138] sm:$0xff] }
  0x1e   :  { %1501 = vmatprep.subr.bf16.mxu1 %v1691_v29  ;;  %v1716_v28 = vld [vmem:[%s2356_s1 + $0x1d0] sm:$0xff]  }
  0x1f   :  { %v1717_v29 = vld [vmem:[%s2356_s1 + $0x190] sm:$0xff]  }
  0x20   :  { %1444 = vmatpush3.bf16.msra.mxu0 %v1692_v30  ;;  %v58_v30 = vld [vmem:[%s2357_s0 + $0x140] sm:$0xff] }
  0x21   :  { %1502 = vmatpush3.bf16.msra.mxu1 %v1693_v31  ;;  %1545 = vmatprep.subr.bf16.mxu0 %v1694_v40  ;;  %v62_v31 = vld [vmem:[%s2357_s0 + $0x160] sm:$0xff]  ;;  %v1720_v40 = vld [vmem:[%s2356_s1 + $0x1c8] sm:$0xff]  }
  0x22   :  { %1603 = vmatprep.subr.bf16.mxu1 %v1696_v42  ;;  %v1349_v37 = vcombine.high %v58_v30, %v62_v31  ;;  %v66_v42 = vld [vmem:[%s2357_s0 + $0x180] sm:$0xff]  ;;  %v1348_v47 = vcombine.low %v58_v30, %v62_v31  ;;  %v61_v30 = vld [vmem:[%s2357_s0 + $0x158] sm:$0xff] }
  0x23   :  { %883 = vmatmul.mubr.bf16.vlgmr.msra.gmra.mxu0 %v1308_v35  ;;  %v1718_v35 = vld [vmem:[%s2356_s1 + $0x148] sm:$0xff]   ;;  %v65_v31 = vld [vmem:[%s2357_s0 + $0x178] sm:$0xff] }
  0x24   :  { %971 = vmatmul.mubr.bf16.vlgmr.msra.gmra.mxu1 %v1310_v38  ;;  %1546 = vmatpush3.bf16.msra.mxu0 %v1695_v41  ;;  %v1719_v38 = vld [vmem:[%s2356_s1 + $0x108] sm:$0xff]  }
  0x25   :  { %1604 = vmatpush3.bf16.msra.mxu1 %v1697_v43  ;;  %890 = vmatprep.mubr.bf16.mxu0 %v1317_v46  ;;  %v1721_v41 = vld [vmem:[%s2356_s1 + $0x188] sm:$0xff]   ;;  %v1728_v46 = vld [vmem:[%s2356_s1 + $0x1c0] sm:$0xff]  }
  0x26   :  { %978 = vmatprep.mubr.bf16.mxu1 %v1319_v49  ;;  %1547 = vmatprep.subr.bf16.mxu0 %v1698_v50  ;;  %v67_v43 = vld [vmem:[%s2357_s0 + $0x188] sm:$0xff]  ;;  %v1350_v49 = vcombine.low %v59_v32, %v63_v33  ;;  %v1357_v50 = vcombine.high %v66_v42, %v66_v42  ;;  %v1346_v33 = vcombine.low %v53_v22, %v57_v23 }
  0x27   :  { %1605 = vmatprep.subr.bf16.mxu1 %v1700_v54  ;;  %v21_v54 = vld [vmem:[%s2357_s0 + $0x18] sm:$0xff]  ;;  %v1358_v57 = vcombine.low %v67_v43, %v67_v43 }
  0x28   :  { %1548 = vmatpush3.bf16.msra.mxu0 %v1699_v52  ;;  %v20_v52 = vld [vmem:[%s2357_s0 + $0x10] sm:$0xff] }
  0x29   :  { %1606 = vmatpush3.bf16.msra.mxu1 %v1701_v55  ;;  %1549 = vmatprep.subr.bf16.mxu0 %v1702_v56  ;;  %v25_v55 = vld [vmem:[%s2357_s0 + $0x38] sm:$0xff]  ;;  %v1356_v56 = vcombine.low %v66_v42, %v66_v42 }
  0x2a   :  { %1607 = vmatprep.subr.bf16.mxu1 %v1704_v0  ;;  %v1315_v59 = vcombine.high %v21_v54, %v25_v55 }
  0x2b   :  { %891 = vmatmul.mubr.bf16.gmra.mxu0 %v1316_v51  ;;  %v1359_v51 = vcombine.high %v67_v43, %v67_v43 }
  0x2c   :  { %979 = vmatmul.mubr.bf16.gmra.mxu1 %v1318_v53  ;;  %898 = vmatprep.mubr.bf16.mxu0 %v1325_v61  ;;  %v24_v53 = vld [vmem:[%s2357_s0 + $0x30] sm:$0xff] }
  0x2d   :  { %986 = vmatprep.mubr.bf16.mxu1 %v1327_v62  ;;  %1550 = vmatpush3.bf16.msra.mxu0 %v1703_v63  ;;  %v1313_v58 = vcombine.high %v20_v52, %v24_v53  ;;  %v32_v61 = vld [vmem:[%s2357_s0 + $0x70] sm:$0xff]  ;;  %v29_v62 = vld [vmem:[%s2357_s0 + $0x58] sm:$0xff]  ;;  %v1312_v0 = vcombine.low %v20_v52, %v24_v53 }
  0x2e   :  { %1608 = vmatpush3.bf16.msra.mxu1 %v1705_v1  ;;  %1551 = vmatprep.subr.bf16.mxu0 %v1706_v3  ;;  %v33_v63 = vld [vmem:[%s2357_s0 + $0x78] sm:$0xff]  ;;  %v1314_v1 = vcombine.low %v21_v54, %v25_v55  ;;  %v1320_v8 = vcombine.low %v28_v60, %v32_v61 }
  0x2f   :  { %1609 = vmatprep.subr.bf16.mxu1 %v1708_v12  ;;  %v1323_v3 = vcombine.high %v29_v62, %v33_v63  ;;  %v44_v12 = vld [vmem:[%s2357_s0 + $0xd0] sm:$0xff] }
  0x31   :  { %1552 = vmatpush3.bf16.msra.mxu0 %v1707_v5  ;;  %v40_v5 = vld [vmem:[%s2357_s0 + $0xb0] sm:$0xff] }
  0x32   :  { %1610 = vmatpush3.bf16.msra.mxu1 %v1709_v13  ;;  %1553 = vmatprep.subr.bf16.mxu0 %v1710_v14  ;;  %v48_v13 = vld [vmem:[%s2357_s0 + $0xf0] sm:$0xff]  ;;  %v45_v14 = vld [vmem:[%s2357_s0 + $0xd8] sm:$0xff] }
  0x33   :  { %899 = vmatmul.mubr.bf16.gmra.mxu0 %v1324_v2  ;;  %1611 = vmatprep.subr.bf16.mxu1 %v1712_v17  ;;  %v1321_v2 = vcombine.high %v28_v60, %v32_v61  ;;  %v1330_v17 = vcombine.low %v37_v6, %v41_v7  ;;  %v1337_v18 = vcombine.high %v44_v12, %v48_v13 }
  0x34   :  { %987 = vmatmul.mubr.bf16.gmra.mxu1 %v1326_v4  ;;  %906 = vmatprep.mubr.bf16.mxu0 %v1333_v9  ;;  %v36_v4 = vld [vmem:[%s2357_s0 + $0x90] sm:$0xff]  ;;  %v1322_v9 = vcombine.low %v29_v62, %v33_v63 }
  0x35   :  { %994 = vmatprep.mubr.bf16.mxu1 %v1335_v11  ;;  %1554 = vmatpush3.bf16.msra.mxu0 %v1711_v15  ;;  %v1329_v10 = vcombine.high %v36_v4, %v40_v5  ;;  %v1331_v11 = vcombine.high %v37_v6, %v41_v7  ;;  %v49_v15 = vld [vmem:[%s2357_s0 + $0xf8] sm:$0xff] }
  0x36   :  { %1612 = vmatpush3.bf16.msra.mxu1 %v1713_v25  ;;  %1555 = vmatprep.subr.bf16.mxu0 %v1714_v26  ;;  %v1339_v19 = vcombine.high %v45_v14, %v49_v15  ;;  %v1338_v25 = vcombine.low %v45_v14, %v49_v15 }
  0x37   :  { %1613 = vmatprep.subr.bf16.mxu1 %v1716_v28  ;;  %v60_v28 = vld [vmem:[%s2357_s0 + $0x150] sm:$0xff] }
  0x39   :  { %1556 = vmatpush3.bf16.msra.mxu0 %v1715_v27  ;;  %v1347_v27 = vcombine.high %v53_v22, %v57_v23 }
  0x3a   :  { %1614 = vmatpush3.bf16.msra.mxu1 %v1717_v29  ;;  %1557 = vmatprep.subr.bf16.mxu0 %v1718_v35  ;;  %v64_v29 = vld [vmem:[%s2357_s0 + $0x170] sm:$0xff]  ;;  %v1355_v35 = vcombine.high %v61_v30, %v65_v31 }
  0x3b   :  { %907 = vmatmul.mubr.bf16.gmra.mxu0 %v1332_v16  ;;  %1615 = vmatprep.subr.bf16.mxu1 %v1720_v40  ;;  %v1328_v16 = vcombine.low %v36_v4, %v40_v5 }
  0x3c   :  { %995 = vmatmul.mubr.bf16.gmra.mxu1 %v1334_v20  ;;  %914 = vmatprep.mubr.bf16.mxu0 %v1341_v21  ;;  %v52_v20 = vld [vmem:[%s2357_s0 + $0x110] sm:$0xff] }
  0x3d   :  { %1002 = vmatprep.mubr.bf16.mxu1 %v1343_v24  ;;  %1558 = vmatpush3.bf16.msra.mxu0 %v1719_v38  ;;  %v56_v21 = vld [vmem:[%s2357_s0 + $0x130] sm:$0xff]  ;;  %v1336_v24 = vcombine.low %v44_v12, %v48_v13  ;;  %v1352_v38 = vcombine.low %v60_v28, %v64_v29 }
  0x3e   :  { %1616 = vmatpush3.bf16.msra.mxu1 %v1721_v41  ;;  %1559 = vmatprep.subr.bf16.mxu0 %v1726_v44  ;;  %v1345_v26 = vcombine.high %v52_v20, %v56_v21  ;;  %v1344_v32 = vcombine.low %v52_v20, %v56_v21  ;;  %v1734_v44 = vmov 0.0  }
  0x3f   :  { %1617 = vmatprep.subr.bf16.mxu1 %v1728_v46  ;;  %1206 = vst [vmem:[%s2358_s4] sm:$0x1] %v1734_v44  ;;  %1207 = vst [vmem:[%s2359_s5] sm:$0x1] %v1734_v44 }
  0x41   :  { %1560 = vmatpush3.bf16.msra.mxu0 %v1727_v45 }
  0x42   :  { %1618 = vmatpush3.bf16.msra.mxu1 %v1729_v48 }
  0x43   :  { %915 = vmatmul.mubr.bf16.gmra.mxu0 %v1340_v34  ;;  %v1353_v34 = vcombine.high %v60_v28, %v64_v29 }
  0x44   :  { %1003 = vmatmul.mubr.bf16.gmra.mxu1 %v1342_v36  ;;  %922 = vmatprep.mubr.bf16.mxu0 %v1349_v37  ;;  %v68_v36 = vld [vmem:[%s2357_s0 + $0x190] sm:$0xff]  ;;  %v69_v37 = vld [vmem:[%s2357_s0 + $0x198] sm:$0xff] }
  0x45   :  { %1010 = vmatprep.mubr.bf16.mxu1 %v1351_v39  ;;  %v1354_v39 = vcombine.low %v61_v30, %v65_v31  ;;  %v1361_v40 = vcombine.high %v68_v36, %v68_v36  ;;  %v1363_v41 = vcombine.high %v69_v37, %v69_v37  ;;  %v1360_v42 = vcombine.low %v68_v36, %v68_v36 }
  0x46   :  { %v1362_v43 = vcombine.low %v69_v37, %v69_v37 }
  0x4b   :  { %923 = vmatmul.mubr.bf16.gmra.mxu0 %v1348_v47 }
  0x4c   :  { %1011 = vmatmul.mubr.bf16.gmra.mxu1 %v1350_v49  ;;  %930 = vmatprep.mubr.bf16.mxu0 %v1357_v50 }
  0x4d   :  { %1018 = vmatprep.mubr.bf16.mxu1 %v1359_v51 }
  0x53   :  { %931 = vmatmul.mubr.bf16.gmra.mxu0 %v1356_v56 }
  0x54   :  { %1019 = vmatmul.mubr.bf16.gmra.mxu1 %v1358_v57  ;;  %1058 = vmatprep.mubr.bf16.mxu0 %v1313_v58 }
  0x55   :  { %1146 = vmatprep.mubr.bf16.mxu1 %v1315_v59 }
  0x5b   :  { %1059 = vmatmul.mubr.bf16.vlgmr.msra.gmra.mxu0 %v1312_v0 }
  0x5c   :  { %1147 = vmatmul.mubr.bf16.vlgmr.msra.gmra.mxu1 %v1314_v1  ;;  %1066 = vmatprep.mubr.bf16.mxu0 %v1321_v2 }
  0x5d   :  { %1154 = vmatprep.mubr.bf16.mxu1 %v1323_v3 }
  0x63   :  { %1067 = vmatmul.mubr.bf16.gmra.mxu0 %v1320_v8 }
  0x64   :  { %1155 = vmatmul.mubr.bf16.gmra.mxu1 %v1322_v9  ;;  %1074 = vmatprep.mubr.bf16.mxu0 %v1329_v10 }
  0x65   :  { %1162 = vmatprep.mubr.bf16.mxu1 %v1331_v11 }
  0x6b   :  { %1075 = vmatmul.mubr.bf16.gmra.mxu0 %v1328_v16 }
  0x6c   :  { %1163 = vmatmul.mubr.bf16.gmra.mxu1 %v1330_v17  ;;  %1082 = vmatprep.mubr.bf16.mxu0 %v1337_v18 }
  0x6d   :  { %1170 = vmatprep.mubr.bf16.mxu1 %v1339_v19 }
  0x73   :  { %1083 = vmatmul.mubr.bf16.gmra.mxu0 %v1336_v24 }
  0x74   :  { %1171 = vmatmul.mubr.bf16.gmra.mxu1 %v1338_v25  ;;  %1090 = vmatprep.mubr.bf16.mxu0 %v1345_v26 }
  0x75   :  { %1178 = vmatprep.mubr.bf16.mxu1 %v1347_v27 }
  0x7b   :  { %1091 = vmatmul.mubr.bf16.gmra.mxu0 %v1344_v32 }
  0x7c   :  { %1179 = vmatmul.mubr.bf16.gmra.mxu1 %v1346_v33  ;;  %1098 = vmatprep.mubr.bf16.mxu0 %v1353_v34 }
  0x7d   :  { %1186 = vmatprep.mubr.bf16.mxu1 %v1355_v35 }
  0x83   :  { %1099 = vmatmul.mubr.bf16.gmra.mxu0 %v1352_v38 }
  0x84   :  { %1187 = vmatmul.mubr.bf16.gmra.mxu1 %v1354_v39  ;;  %1106 = vmatprep.mubr.bf16.mxu0 %v1361_v40 }
  0x85   :  { %1194 = vmatprep.mubr.bf16.mxu1 %v1363_v41 }
  0x8b   :  { %1107 = vmatmul.mubr.bf16.gmra.mxu0 %v1360_v42 }
  0x8c   :  { %1195 = vmatmul.mubr.bf16.gmra.mxu1 %v1362_v43 }
  0xe3   :  { %v1445_v45 = vpop.f32.mrf.mxu0 }
  0xe4   :  { %v1503_v46 = vpop.f32.mrf.mxu1 }
  0xe5   :  { %v1446_v47 = vpop.f32.mrf.mxu0 }
  0xe6   :  { %v1504_v48 = vpop.f32.mrf.mxu1  ;;  %v1447_v36 = vadd.f32 %v1446_v47, %v1445_v45 }
  0xe7   :  { %v1448_v49 = vpop.f32.mrf.mxu0  ;;  %v1505_v37 = vadd.f32 %v1504_v48, %v1503_v46 }
  0xe8   :  { %v1506_v50 = vpop.f32.mrf.mxu1 }
  0xe9   :  { %v1449_v51 = vpop.f32.mrf.mxu0  ;;  %v973_v44 = vadd.f32 %v1505_v37, %v1447_v36 }
  0xea   :  { %v1507_v52 = vpop.f32.mrf.mxu1  ;;  %v1450_v41 = vadd.f32 %v1449_v51, %v1448_v49 }
  0xeb   :  { %v2119_v53 = vpop.f32.mrf.mxu0  ;;  %v1508_v42 = vadd.f32 %v1507_v52, %v1506_v50 }
  0xec   :  { %v2121_v54 = vpop.f32.mrf.mxu1 }
  0xed   :  { %v2123_v55 = vpop.f32.mrf.mxu0 }
  0xee   :  { %v2125_v56 = vpop.f32.mrf.mxu1  ;;  %v1453_v46 = vadd.f32 %v2123_v55, %v2119_v53 }
  0xef   :  { %v2127_v57 = vpop.f32.mrf.mxu0  ;;  %v1511_v47 = vadd.f32 %v2125_v56, %v2121_v54 }
  0xf0   :  { %v2129_v58 = vpop.f32.mrf.mxu1 }
  0xf1   :  { %v2131_v59 = vpop.f32.mrf.mxu0  ;;  %v981_v36 = vadd.f32 %v1511_v47, %v1453_v46 }
  0xf2   :  { %v2133_v60 = vpop.f32.mrf.mxu1 }
  0xf3   :  { %v2135_v61 = vpop.f32.mrf.mxu0  ;;  %v1514_v53 = vadd.f32 %v2133_v60, %v2129_v58 }
  0xf4   :  { %v2137_v62 = vpop.f32.mrf.mxu1 }
  0xf5   :  { %v2139_v63 = vpop.f32.mrf.mxu0 }
  0xf6   :  { %v2141_v0 = vpop.f32.mrf.mxu1  ;;  %v1459_v58 = vadd.f32 %v2139_v63, %v2135_v61 }
  0xf7   :  { %v2143_v1 = vpop.f32.mrf.mxu0  ;;  %v1517_v60 = vadd.f32 %v2141_v0, %v2137_v62 }
  0xf8   :  { %v2145_v2 = vpop.f32.mrf.mxu1 }
  0xf9   :  { %v2147_v3 = vpop.f32.mrf.mxu0  ;;  %v989_v0 = vadd.f32 %v1517_v60, %v1459_v58 }
  0xfa   :  { %v2149_v4 = vpop.f32.mrf.mxu1  ;;  %v1462_v61 = vadd.f32 %v2147_v3, %v2143_v1 }
  0xfb   :  { %v2151_v5 = vpop.f32.mrf.mxu0  ;;  %v1520_v62 = vadd.f32 %v2149_v4, %v2145_v2 }
  0xfc   :  { %v2153_v6 = vpop.f32.mrf.mxu1 }
  0xfd   :  { %v2155_v7 = vpop.f32.mrf.mxu0  ;;  %v992_v3 = vadd.f32 %v1520_v62, %v1462_v61 }
  0xfe   :  { %v2157_v8 = vpop.f32.mrf.mxu1  ;;  %v1465_v2 = vadd.f32 %v2155_v7, %v2151_v5 }
  0xff   :  { %v2159_v9 = vpop.f32.mrf.mxu0  ;;  %v1523_v4 = vadd.f32 %v2157_v8, %v2153_v6 }
 0x100   :  { %v2161_v10 = vpop.f32.mrf.mxu1 }
 0x101   :  { %v2163_v11 = vpop.f32.mrf.mxu0  ;;  %v997_v8 = vadd.f32 %v1523_v4, %v1465_v2 }
 0x102   :  { %v2165_v12 = vpop.f32.mrf.mxu1  ;;  %v1468_v5 = vadd.f32 %v2163_v11, %v2159_v9 }
 0x103   :  { %v2167_v13 = vpop.f32.mrf.mxu0  ;;  %v1526_v6 = vadd.f32 %v2165_v12, %v2161_v10 }
 0x104   :  { %v2169_v14 = vpop.f32.mrf.mxu1 }
 0x105   :  { %v2171_v15 = vpop.f32.mrf.mxu0  ;;  %v1000_v11 = vadd.f32 %v1526_v6, %v1468_v5 }
 0x106   :  { %v2173_v16 = vpop.f32.mrf.mxu1  ;;  %v1471_v10 = vadd.f32 %v2171_v15, %v2167_v13 }
 0x107   :  { %v2175_v17 = vpop.f32.mrf.mxu0  ;;  %v1529_v12 = vadd.f32 %v2173_v16, %v2169_v14 }
 0x108   :  { %v2177_v18 = vpop.f32.mrf.mxu1 }
 0x109   :  { %v2179_v19 = vpop.f32.mrf.mxu0 }
 0x10a   :  { %v2181_v20 = vpop.f32.mrf.mxu1 }
 0x10b   :  { %v2183_v21 = vpop.f32.mrf.mxu0  ;;  %v1532_v14 = vadd.f32 %v2181_v20, %v2177_v18 }
 0x10c   :  { %v2185_v22 = vpop.f32.mrf.mxu1 }
 0x10d   :  { %v2187_v23 = vpop.f32.mrf.mxu0 }
 0x10e   :  { %v2189_v24 = vpop.f32.mrf.mxu1 }
 0x10f   :  { %v2191_v25 = vpop.f32.mrf.mxu0 }
 0x110   :  { %2362 = vst [vmem:[#allocation2_spill] sm:$0xff] %v2191_v25  ;;  %v2193_v26 = vpop.f32.mrf.mxu1  ;;  %v976_v25 = vadd.f32 %v1508_v42, %v1450_v41 }
 0x111   :  { %2363 = vst [vmem:[#allocation3_spill] sm:$0xff] %v2193_v26  ;;  %v2195_v27 = vpop.f32.mrf.mxu0 }
 0x112   :  { %2364 = vst [vmem:[#allocation4_spill] sm:$0xff] %v2195_v27  ;;  %v2197_v28 = vpop.f32.mrf.mxu1 }
 0x113   :  { %2365 = vst [vmem:[#allocation5_spill] sm:$0xff] %v2197_v28  ;;  %v2199_v29 = vpop.f32.mrf.mxu0 }
 0x114   :  { %2366 = vst [vmem:[#allocation6_spill] sm:$0xff] %v2199_v29  ;;  %v2201_v30 = vpop.f32.mrf.mxu1 }
 0x115   :  { %2367 = vst [vmem:[#allocation7_spill] sm:$0xff] %v2201_v30  ;;  %v2203_v31 = vpop.f32.mrf.mxu0 }
 0x116   :  { %2368 = vst [vmem:[#allocation8_spill] sm:$0xff] %v2203_v31  ;;  %v2205_v32 = vpop.f32.mrf.mxu1 }
 0x117   :  { %v1484_v33 = vpop.f32.mrf.mxu0  ;;  %v2369_v5 = vld [vmem:[#allocation2_spill] sm:$0xff] }
 0x118   :  { %v1542_v34 = vpop.f32.mrf.mxu1  ;;  %v2210_v33 = vld [vmem:[%s2360_s2] ss:$0 sm:$0xff] }
 0x119   :  { %v1485_v35 = vpop.f32.mrf.mxu0  ;;  %v2370_v6 = vld [vmem:[#allocation4_spill] sm:$0xff] }
 0x11a   :  { %v1543_v38 = vpop.f32.mrf.mxu1  ;;  %v1456_v35 = vadd.f32 %v2131_v59, %v2127_v57 }
 0x11b   :  { %v1561_v39 = vpop.f32.mrf.mxu0 }
 0x11c   :  { %v1619_v40 = vpop.f32.mrf.mxu1  ;;  %v984_v59 = vadd.f32 %v1514_v53, %v1456_v35 }
 0x11d   :  { %v1562_v43 = vpop.f32.mrf.mxu0 }
 0x11e   :  { %v1563_v28 = vadd.f32 %v1562_v43, %v1561_v39  ;;  %v1620_v29 = vpop.f32.mrf.mxu1 }
 0x11f   :  { %v1564_v26 = vpop.f32.mrf.mxu0  ;;  %v1621_v27 = vadd.f32 %v1620_v29, %v1619_v40 }
 0x120   :  { %v1061_v30 = vadd.f32 %v1563_v28, %v973_v44  ;;  %v1622_v31 = vpop.f32.mrf.mxu1 }
 0x121   :  { %v1565_v45 = vpop.f32.mrf.mxu0 }
 0x122   :  { %v2216_v48 = vadd.f32 %v1621_v27, %v1061_v30  ;;  %v1566_v49 = vadd.f32 %v1565_v45, %v1564_v26  ;;  %v1623_v50 = vpop.f32.mrf.mxu1 }
 0x123   :  { %v1567_v51 = vpop.f32.mrf.mxu0  ;;  %v1624_v29 = vadd.f32 %v1623_v50, %v1622_v31 }
 0x124   :  { %v1270_v52 = vadd.f32 %v2210_v33, %v2216_v48  ;;  %v1064_v28 = vadd.f32 %v1566_v49, %v976_v25  ;;  %v1625_v34 = vpop.f32.mrf.mxu1  ;;  %v1230_v16 = vmul.f32 %v2216_v48, %v2216_v48 }
 0x125   :  { %v1568_v55 = vpop.f32.mrf.mxu0 }
 0x126   :  { %1283 = vst [vmem:[%s2361_s3] sm:$0xff] %v1270_v52  ;;  %v2227_v54 = vadd.f32 %v1624_v29, %v1064_v28  ;;  %v1569_v56 = vadd.f32 %v1568_v55, %v1567_v51  ;;  %v1626_v26 = vpop.f32.mrf.mxu1 }
 0x127   :  { %v1570_v27 = vpop.f32.mrf.mxu0  ;;  %v1627_v31 = vadd.f32 %v1626_v26, %v1625_v34 }
 0x128   :  { %v1271_v25 = vadd.f32 %v2210_v33, %v2227_v54  ;;  %v1069_v30 = vadd.f32 %v1569_v56, %v981_v36  ;;  %v1628_v57 = vpop.f32.mrf.mxu1  ;;  %v1209_v62 = vadd.f32 %v2227_v54, %v2216_v48 }
 0x129   :  { %v1571_v37 = vpop.f32.mrf.mxu0 }
 0x12a   :  { %1284 = vst [vmem:[%s2361_s3 + $0x8] sm:$0xff] %v1271_v25  ;;  %v2238_v38 = vadd.f32 %v1627_v31, %v1069_v30  ;;  %v1572_v39 = vadd.f32 %v1571_v37, %v1570_v27  ;;  %v1629_v40 = vpop.f32.mrf.mxu1 }
 0x12b   :  { %v1573_v41 = vpop.f32.mrf.mxu0  ;;  %v1630_v44 = vadd.f32 %v1629_v40, %v1628_v57 }
 0x12c   :  { %v1272_v42 = vadd.f32 %v2210_v33, %v2238_v38  ;;  %v1072_v43 = vadd.f32 %v1572_v39, %v984_v59  ;;  %v1631_v45 = vpop.f32.mrf.mxu1  ;;  %v1210_v18 = vadd.f32 %v1209_v62, %v2238_v38  ;;  %v2374_v62 = vld [vmem:[#allocation8_spill] sm:$0xff] }
 0x12d   :  { %v1574_v63 = vpop.f32.mrf.mxu0 }
 0x12e   :  { %1285 = vst [vmem:[%s2361_s3 + $0x10] sm:$0xff] %v1272_v42  ;;  %v2249_v46 = vadd.f32 %v1630_v44, %v1072_v43  ;;  %v1575_v47 = vadd.f32 %v1574_v63, %v1573_v41  ;;  %v1632_v49 = vpop.f32.mrf.mxu1  ;;  %v1231_v42 = vmul.f32 %v2227_v54, %v2227_v54  ;;  %v1474_v44 = vadd.f32 %v2179_v19, %v2175_v17 }
 0x12f   :  { %v1576_v50 = vpop.f32.mrf.mxu0  ;;  %v1633_v28 = vadd.f32 %v1632_v49, %v1631_v45  ;;  %v1232_v63 = vmul.f32 %v2238_v38, %v2238_v38  ;;  %v1477_v38 = vadd.f32 %v2187_v23, %v2183_v21  ;;  %v1480_v21 = vadd.f32 %v2370_v6, %v2369_v5 }
 0x130   :  { %v1273_v51 = vadd.f32 %v2210_v33, %v2249_v46  ;;  %v1077_v52 = vadd.f32 %v1575_v47, %v989_v0  ;;  %v1634_v1 = vpop.f32.mrf.mxu1  ;;  %v1005_v47 = vadd.f32 %v1529_v12, %v1471_v10  ;;  %v1233_v20 = vmul.f32 %v2249_v46, %v2249_v46 }
 0x131   :  { %v1577_v29 = vpop.f32.mrf.mxu0 }
 0x132   :  { %1286 = vst [vmem:[%s2361_s3 + $0x18] sm:$0xff] %v1273_v51  ;;  %v2260_v34 = vadd.f32 %v1633_v28, %v1077_v52  ;;  %v1578_v35 = vadd.f32 %v1577_v29, %v1576_v50  ;;  %v1635_v53 = vpop.f32.mrf.mxu1  ;;  %v1243_v50 = vadd.f32 %v1231_v42, %v1230_v16  ;;  %v1211_v29 = vadd.f32 %v1210_v18, %v2249_v46  ;;  %v2373_v16 = vld [vmem:[#allocation6_spill] sm:$0xff] }
 0x133   :  { %v1579_v55 = vpop.f32.mrf.mxu0  ;;  %v1636_v26 = vadd.f32 %v1635_v53, %v1634_v1  ;;  %v1008_v1 = vadd.f32 %v1532_v14, %v1474_v44 }
 0x134   :  { %v1274_v36 = vadd.f32 %v2210_v33, %v2260_v34  ;;  %v1080_v56 = vadd.f32 %v1578_v35, %v992_v3  ;;  %v1637_v27 = vpop.f32.mrf.mxu1  ;;  %v1244_v3 = vadd.f32 %v1243_v50, %v1232_v63  ;;  %v1234_v2 = vmul.f32 %v2260_v34, %v2260_v34 }
 0x135   :  { %v1580_v7 = vpop.f32.mrf.mxu0  ;;  %v1535_v35 = vadd.f32 %v2189_v24, %v2185_v22  ;;  %v1212_v46 = vadd.f32 %v1211_v29, %v2260_v34  ;;  %v1483_v63 = vadd.f32 %v2374_v62, %v2373_v16 }
 0x136   :  { %1287 = vst [vmem:[%s2361_s3 + $0x20] sm:$0xff] %v1274_v36  ;;  %v2271_v25 = vadd.f32 %v1636_v26, %v1080_v56  ;;  %v1581_v30 = vadd.f32 %v1580_v7, %v1579_v55  ;;  %v1638_v31 = vpop.f32.mrf.mxu1  ;;  %v1245_v56 = vadd.f32 %v1244_v3, %v1233_v20 }
 0x137   :  { %v1582_v57 = vpop.f32.mrf.mxu0  ;;  %v1639_v58 = vadd.f32 %v1638_v31, %v1637_v27 }
 0x138   :  { %v1275_v59 = vadd.f32 %v2210_v33, %v2271_v25  ;;  %v1085_v37 = vadd.f32 %v1581_v30, %v997_v8  ;;  %v1640_v9 = vpop.f32.mrf.mxu1  ;;  %v1235_v26 = vmul.f32 %v2271_v25, %v2271_v25  ;;  %v2371_v8 = vld [vmem:[#allocation3_spill] sm:$0xff]  ;;  %v2372_v30 = vld [vmem:[#allocation5_spill] sm:$0xff] }
 0x139   :  { %v1583_v60 = vpop.f32.mrf.mxu0  ;;  %v1538_v31 = vadd.f32 %v2372_v30, %v2371_v8 }
 0x13a   :  { %1288 = vst [vmem:[%s2361_s3 + $0x28] sm:$0xff] %v1275_v59  ;;  %v1173_v39 = vadd.f32 %v1639_v58, %v1085_v37  ;;  %v1584_v40 = vadd.f32 %v1583_v60, %v1582_v57  ;;  %v1641_v41 = vpop.f32.mrf.mxu1  ;;  %v1246_v57 = vadd.f32 %v1245_v56, %v1234_v2  ;;  %v1213_v59 = vadd.f32 %v1212_v46, %v2271_v25 }
 0x13b   :  { %v1585_v43 = vpop.f32.mrf.mxu0  ;;  %v1642_v15 = vadd.f32 %v1641_v41, %v1640_v9  ;;  %v1013_v58 = vadd.f32 %v1535_v35, %v1477_v38  ;;  %v1016_v25 = vadd.f32 %v1538_v31, %v1480_v21 }
 0x13c   :  { %v1276_v45 = vadd.f32 %v2210_v33, %v1173_v39  ;;  %v1088_v13 = vadd.f32 %v1584_v40, %v1000_v11  ;;  %v1643_v61 = vpop.f32.mrf.mxu1  ;;  %v1236_v37 = vmul.f32 %v1173_v39, %v1173_v39  ;;  %v1247_v10 = vadd.f32 %v1246_v57, %v1235_v26 }
 0x13d   :  { %v1586_v0 = vpop.f32.mrf.mxu0  ;;  %v1214_v12 = vadd.f32 %v1213_v59, %v1173_v39 }
 0x13e   :  { %1289 = vst [vmem:[%s2361_s3 + $0x30] sm:$0xff] %v1276_v45  ;;  %v1176_v17 = vadd.f32 %v1642_v15, %v1088_v13  ;;  %v1587_v19 = vadd.f32 %v1586_v0, %v1585_v43  ;;  %v1644_v49 = vpop.f32.mrf.mxu1  ;;  %v1248_v13 = vadd.f32 %v1247_v10, %v1236_v37  ;;  %v2375_v0 = vld [vmem:[#allocation7_spill] sm:$0xff] }
 0x13f   :  { %v1588_v51 = vpop.f32.mrf.mxu0  ;;  %v1645_v52 = vadd.f32 %v1644_v49, %v1643_v61 }
 0x140   :  { %v1277_v48 = vadd.f32 %v2210_v33, %v1176_v17  ;;  %v1093_v54 = vadd.f32 %v1587_v19, %v1005_v47  ;;  %v1646_v28 = vpop.f32.mrf.mxu1  ;;  %v1237_v40 = vmul.f32 %v1176_v17, %v1176_v17  ;;  %v1215_v15 = vadd.f32 %v1214_v12, %v1176_v17  ;;  %v1208_v12 = vld [vmem:[%s2358_s4] sm:$0x1] }
 0x141   :  { %v1589_v4 = vpop.f32.mrf.mxu0  ;;  %v1541_v47 = vadd.f32 %v2205_v32, %v2375_v0 }
 0x142   :  { %1290 = vst [vmem:[%s2361_s3 + $0x38] sm:$0xff] %v1277_v48  ;;  %v1181_v53 = vadd.f32 %v1645_v52, %v1093_v54  ;;  %v1590_v55 = vadd.f32 %v1589_v4, %v1588_v51  ;;  %v1647_v36 = vpop.f32.mrf.mxu1  ;;  %v1249_v50 = vadd.f32 %v1248_v13, %v1237_v40 }
 0x143   :  { %v1591_v27 = vpop.f32.mrf.mxu0  ;;  %v1648_v24 = vadd.f32 %v1647_v36, %v1646_v28  ;;  %v1021_v32 = vadd.f32 %v1541_v47, %v1483_v63 }
 0x144   :  { %v1278_v23 = vadd.f32 %v2210_v33, %v1181_v53  ;;  %v1096_v22 = vadd.f32 %v1590_v55, %v1008_v1  ;;  %v1649_v7 = vpop.f32.mrf.mxu1  ;;  %v1238_v61 = vmul.f32 %v1181_v53, %v1181_v53  ;;  %v1216_v18 = vadd.f32 %v1215_v15, %v1181_v53 }
 0x145   :  { %v1592_v34 = vpop.f32.mrf.mxu0 }
 0x146   :  { %1291 = vst [vmem:[%s2361_s3 + $0x40] sm:$0xff] %v1278_v23  ;;  %v1184_v9 = vadd.f32 %v1648_v24, %v1096_v22  ;;  %v1593_v11 = vadd.f32 %v1592_v34, %v1591_v27  ;;  %v1650_v60 = vpop.f32.mrf.mxu1  ;;  %v1250_v28 = vadd.f32 %v1249_v50, %v1238_v61 }
 0x147   :  { %v1594_v41 = vpop.f32.mrf.mxu0  ;;  %v1651_v44 = vadd.f32 %v1650_v60, %v1649_v7 }
 0x148   :  { %v1279_v42 = vadd.f32 %v2210_v33, %v1184_v9  ;;  %v1101_v43 = vadd.f32 %v1593_v11, %v1013_v58  ;;  %v1652_v45 = vpop.f32.mrf.mxu1  ;;  %v1239_v20 = vmul.f32 %v1184_v9, %v1184_v9  ;;  %v1217_v1 = vadd.f32 %v1216_v18, %v1184_v9 }
 0x149   :  { %v1595_v14 = vpop.f32.mrf.mxu0 }
 0x14a   :  { %1292 = vst [vmem:[%s2361_s3 + $0x48] sm:$0xff] %v1279_v42  ;;  %v1189_v39 = vadd.f32 %v1651_v44, %v1101_v43  ;;  %v1596_v19 = vadd.f32 %v1595_v14, %v1594_v41  ;;  %v1653_v49 = vpop.f32.mrf.mxu1  ;;  %v1251_v35 = vadd.f32 %v1250_v28, %v1239_v20  ;;  %v1229_v41 = vld [vmem:[%s2359_s5] sm:$0x1] }
 0x14b   :  { %v1597_v51 = vpop.f32.mrf.mxu0  ;;  %v1654_v54 = vadd.f32 %v1653_v49, %v1652_v45 }
 0x14c   :  { %v1280_v17 = vadd.f32 %v2210_v33, %v1189_v39  ;;  %v1104_v48 = vadd.f32 %v1596_v19, %v1016_v25  ;;  %v1655_v52 = vpop.f32.mrf.mxu1  ;;  %v1240_v29 = vmul.f32 %v1189_v39, %v1189_v39  ;;  %v1218_v53 = vadd.f32 %v1217_v1, %v1189_v39 }
 0x14d   :  { %v1598_v3 = vpop.f32.mrf.mxu0 }
 0x14e   :  { %1293 = vst [vmem:[%s2361_s3 + $0x50] sm:$0xff] %v1280_v17  ;;  %v1192_v2 = vadd.f32 %v1654_v54, %v1104_v48  ;;  %v1599_v4 = vadd.f32 %v1598_v3, %v1597_v51  ;;  %v1656_v38 = vpop.f32.mrf.mxu1  ;;  %v1252_v6 = vadd.f32 %v1251_v35, %v1240_v29 }
 0x14f   :  { %v1600_v55 = vpop.f32.mrf.mxu0  ;;  %v1657_v26 = vadd.f32 %v1656_v38, %v1655_v52 }
 0x150   :  { %v1241_v36 = vmul.f32 %v1192_v2, %v1192_v2  ;;  %v1281_v56 = vadd.f32 %v2210_v33, %v1192_v2  ;;  %v1109_v46 = vadd.f32 %v1599_v4, %v1021_v32  ;;  %v1658_v27 = vpop.f32.mrf.mxu1  ;;  %v1219_v21 = vadd.f32 %v1218_v53, %v1192_v2 }
 0x151   :  { %v1601_v5 = vpop.f32.mrf.mxu0 }
 0x152   :  { %1294 = vst [vmem:[%s2361_s3 + $0x58] sm:$0xff] %v1281_v56  ;;  %v1197_v23 = vadd.f32 %v1657_v26, %v1109_v46  ;;  %v1659_v22 = vpop.f32.mrf.mxu1  ;;  %v1253_v24 = vadd.f32 %v1252_v6, %v1241_v36 }
 0x154   :  { %v1220_v7 = vadd.f32 %v1219_v21, %v1197_v23  ;;  %v1242_v8 = vmul.f32 %v1197_v23, %v1197_v23  ;;  %v1282_v30 = vadd.f32 %v2210_v33, %v1197_v23 }
 0x156   :  { %v1221_v31 = vrot.slane %v1220_v7, 4  ;;  %v1254_v57 = vadd.f32 %v1253_v24, %v1242_v8  ;;  %1295 = vst [vmem:[%s2361_s3 + $0x60] sm:$0xff] %v1282_v30 }
 0x158   :  { %v1222_v59 = vadd.f32 %v1221_v31, %v1220_v7  ;;  %v1255_v37 = vrot.slane %v1254_v57, 4 }
 0x15a   :  { %v1223_v34 = vrot.slane %v1222_v59, 2  ;;  %v1256_v58 = vadd.f32 %v1255_v37, %v1254_v57 }
 0x15c   :  { %v1224_v9 = vadd.f32 %v1223_v34, %v1222_v59  ;;  %v1257_v11 = vrot.slane %v1256_v58, 2 }
 0x15e   :  { %v1225_v60 = vrot.slane %v1224_v9, 1  ;;  %v1258_v10 = vadd.f32 %v1257_v11, %v1256_v58 }
 0x160   :  { %v1226_v40 = vadd.f32 %v1225_v60, %v1224_v9  ;;  %v1259_v33 = vrot.slane %v1258_v10, 1 }
 0x162   :  { %v1227_v42 = vadd.f32 %v1226_v40, %v1208_v12  ;;  %v1260_v43 = vadd.f32 %v1259_v33, %v1258_v10 }
 0x164   :  { %1228 = vst [vmem:[%s2358_s4] sm:$0x1] %v1227_v42  ;;  %v1261_v44 = vadd.f32 %v1260_v43, %v1229_v41 }
 0x166   :  { %1262 = vst [vmem:[%s2359_s5] sm:$0x1] %v1261_v44 }

// kernel: cnn_discriminator_forward.5
= control target key start
LH: loop header
LB: loop body
LE: loop exit
PB: predicated region body
PF: predicated region fallthrough
CT: control target
= control target key end

     0   :  { %s1557_s0 = inlined_call_operand.vmem [shape: f32[8,49,128], index: 0, kind: input, shape index: {}]   ;;  %s1558_s2 = inlined_call_operand.vmem [shape: f32[1,128], index: 2, kind: input, shape index: {}]   ;;  %s1559_s3 = inlined_call_operand.vmem [shape: f32[1,128], index: 3, kind: input, shape index: {}]   ;;  %s1560_s1 = inlined_call_operand.vmem [shape: f32[49,128], index: 1, kind: input, shape index: {}]   ;;  %s1561_s4 = inlined_call_operand.<no memory space> [shape: f32[1,1], index: 4, kind: input, shape index: {}]   ;;  %s1562_s5 = inlined_call_operand.vmem [shape: f32[8,1], index: 5, kind: output, shape index: {}]  }
   0x1   :  { %v29_v0 = vld [vmem:[%s1557_s0 + $0x38] sm:$0xff]  ;;  %v983_v1 = vld [vmem:[%s1558_s2] ss:$0 sm:$0xff]  ;;  %v23_v8 = vld [vmem:[%s1557_s0 + $0x8] sm:$0xff] }
   0x2   :  { %v988_v2 = vld [vmem:[%s1559_s3] ss:$0 sm:$0xff]  ;;  %v92_v3 = vmul.f32 %v983_v1, %v29_v0  ;;  %v31_v9 = vld [vmem:[%s1557_s0 + $0x48] sm:$0xff]  ;;  %v86_v11 = vmul.f32 %v983_v1, %v23_v8  ;;  %v24_v13 = vld [vmem:[%s1557_s0 + $0x10] sm:$0xff] }
   0x3   :  { %v22_v4 = vld [vmem:[%s1557_s0] sm:$0xff]  ;;  %v94_v12 = vmul.f32 %v983_v1, %v31_v9  ;;  %v37_v14 = vld [vmem:[%s1557_s0 + $0x78] sm:$0xff]  ;;  %v87_v17 = vmul.f32 %v983_v1, %v24_v13  ;;  %v1028_v26 = vld [vmem:[%s1560_s1 + $0x8] sm:$0xff] }
   0x4   :  { %v30_v5 = vld [vmem:[%s1557_s0 + $0x40] sm:$0xff]  ;;  %v85_v6 = vmul.f32 %v983_v1, %v22_v4  ;;  %v155_v10 = vadd.f32 %v988_v2, %v92_v3  ;;  %v100_v18 = vmul.f32 %v983_v1, %v37_v14  ;;  %v149_v21 = vadd.f32 %v988_v2, %v86_v11  ;;  %v36_v28 = vld [vmem:[%s1557_s0 + $0x70] sm:$0xff]  ;;  %v25_v37 = vld [vmem:[%s1557_s0 + $0x18] sm:$0xff] }
   0x5   :  { %v93_v7 = vmul.f32 %v983_v1, %v30_v5  ;;  %v1021_v20 = vld [vmem:[%s1560_s1] sm:$0xff]  ;;  %v157_v22 = vadd.f32 %v988_v2, %v94_v12  ;;  %v32_v33 = vld [vmem:[%s1557_s0 + $0x50] sm:$0xff]  ;;  %v150_v36 = vadd.f32 %v988_v2, %v87_v17  ;;  %v99_v41 = vmul.f32 %v983_v1, %v36_v28  ;;  %v43_v42 = vld [vmem:[%s1557_s0 + $0xa8] sm:$0xff] }
   0x6   :  { %v148_v15 = vadd.f32 %v988_v2, %v85_v6  ;;  %vm211_vm0 = vcmp.ge.f32.partialorder %v155_v10, 0.0  ;;  %v267_v19 = vmul.f32 0.2, %v155_v10  ;;  %vm205_vm3 = vcmp.ge.f32.partialorder %v149_v21, 0.0  ;;  %v38_v43 = vld [vmem:[%s1557_s0 + $0x80] sm:$0xff]  ;;  %v1056_v45 = vld [vmem:[%s1560_s1 + $0x10] sm:$0xff] }
   0x7   :  { %v156_v16 = vadd.f32 %v988_v2, %v93_v7  ;;  %v261_v27 = vmul.f32 0.2, %v149_v21  ;;  %vm213_vm4 = vcmp.ge.f32.partialorder %v157_v22, 0.0  ;;  %v269_v32 = vmul.f32 0.2, %v157_v22  ;;  %v26_v55 = vld [vmem:[%s1557_s0 + $0x20] sm:$0xff] }
   0x8   :  { %vm204_vm1 = vcmp.ge.f32.partialorder %v148_v15, 0.0  ;;  %v260_v23 = vmul.f32 0.2, %v148_v15  ;;  %v323_v25 = vsel %vm211_vm0, %v155_v10, %v267_v19  ;;  %v163_v40 = vadd.f32 %v988_v2, %v100_v18  ;;  %v44_v4 = vld [vmem:[%s1557_s0 + $0xb0] sm:$0xff]  ;;  %v39_v6 = vld [vmem:[%s1557_s0 + $0x88] sm:$0xff]  ;;  %v33_v7 = vld [vmem:[%s1557_s0 + $0x58] sm:$0xff] }
   0x9   :  { %vm212_vm2 = vcmp.ge.f32.partialorder %v156_v16, 0.0  ;;  %v268_v24 = vmul.f32 0.2, %v156_v16  ;;  %v386_v29 = vmul.f32 %v1021_v20, %v323_v25  ;;  %v317_v35 = vsel %vm205_vm3, %v149_v21, %v261_v27  ;;  %v1086_v10 = vld [vmem:[%s1560_s1 + $0x18] sm:$0xff]  ;;  %v50_v19 = vld [vmem:[%s1557_s0 + $0xe0] sm:$0xff]  ;;  %v27_v28 = vld [vmem:[%s1557_s0 + $0x28] sm:$0xff] }
   0xa   :  { %v316_v30 = vsel %vm204_vm1, %v148_v15, %v260_v23  ;;  %v380_v39 = vmul.f32 %v1028_v26, %v317_v35  ;;  %v325_v44 = vsel %vm213_vm4, %v157_v22, %v269_v32  ;;  %vm206_vm5 = vcmp.ge.f32.partialorder %v150_v36, 0.0  ;;  %v45_v22 = vld [vmem:[%s1557_s0 + $0xb8] sm:$0xff] }
   0xb   :  { %v324_v31 = vsel %vm212_vm2, %v156_v16, %v268_v24  ;;  %v379_v34 = vmul.f32 %v1021_v20, %v316_v30  ;;  %451 = vadd.xlane.f32.xlu1 %v386_v29  ;;  %v262_v46 = vmul.f32 0.2, %v150_v36  ;;  %v95_v47 = vmul.f32 %v983_v1, %v32_v33 }
   0xc   :  { %v387_v38 = vmul.f32 %v1028_v26, %v324_v31  ;;  %vm219_vm6 = vcmp.ge.f32.partialorder %v163_v40, 0.0  ;;  %v275_v48 = vmul.f32 0.2, %v163_v40  ;;  %v162_v49 = vadd.f32 %v988_v2, %v99_v41  ;;  %v51_v31 = vld [vmem:[%s1557_s0 + $0xe8] sm:$0xff] }
   0xd   :  { %435 = vadd.xlane.f32.xlu0 %v379_v34  ;;  %v88_v50 = vmul.f32 %v983_v1, %v25_v37  ;;  %v318_v51 = vsel %vm206_vm5, %v150_v36, %v262_v46  ;;  %v158_v52 = vadd.f32 %v988_v2, %v95_v47  ;;  %v106_v53 = vmul.f32 %v983_v1, %v43_v42 }
   0xe   :  { %v101_v54 = vmul.f32 %v983_v1, %v38_v43  ;;  %v388_v56 = vmul.f32 %v1056_v45, %v325_v44  ;;  %v381_v57 = vmul.f32 %v1056_v45, %v318_v51  ;;  %vm218_vm7 = vcmp.ge.f32.partialorder %v162_v49, 0.0  ;;  %v40_v44 = vld [vmem:[%s1557_s0 + $0x90] sm:$0xff] }
   0xf   :  { %453 = vadd.xlane.f32.xlu1 %v387_v38  ;;  %v274_v58 = vmul.f32 0.2, %v162_v49  ;;  %v331_v59 = vsel %vm219_vm6, %v163_v40, %v275_v48  ;;  %vm214_vm8 = vcmp.ge.f32.partialorder %v158_v52, 0.0  ;;  %v270_v60 = vmul.f32 0.2, %v158_v52 }
  0x10   :  { %v151_v61 = vadd.f32 %v988_v2, %v88_v50  ;;  %v169_v63 = vadd.f32 %v988_v2, %v106_v53  ;;  %v164_v0 = vadd.f32 %v988_v2, %v101_v54  ;;  %v89_v3 = vmul.f32 %v983_v1, %v26_v55 }
  0x11   :  { %437 = vadd.xlane.f32.xlu0 %v380_v39  ;;  %v330_v62 = vsel %vm218_vm7, %v162_v49, %v274_v58  ;;  %v394_v8 = vmul.f32 %v1028_v26, %v331_v59  ;;  %v326_v9 = vsel %vm214_vm8, %v158_v52, %v270_v60  ;;  %v107_v14 = vmul.f32 %v983_v1, %v44_v4  ;;  %v1117_v39 = vld [vmem:[%s1560_s1 + $0x20] sm:$0xff]  ;;  %v52_v58 = vld [vmem:[%s1557_s0 + $0xf0] sm:$0xff] }
  0x12   :  { %vm207_vm9 = vcmp.ge.f32.partialorder %v151_v61, 0.0  ;;  %v263_v5 = vmul.f32 0.2, %v151_v61  ;;  %v281_v11 = vmul.f32 0.2, %v169_v63  ;;  %v393_v12 = vmul.f32 %v1021_v20, %v330_v62  ;;  %v34_v49 = vld [vmem:[%s1557_s0 + $0x60] sm:$0xff] }
  0x13   :  { %455 = vadd.xlane.f32.xlu1 %v388_v56  ;;  %vm225_vm10 = vcmp.ge.f32.partialorder %v169_v63, 0.0  ;;  %v152_v13 = vadd.f32 %v988_v2, %v89_v3  ;;  %v276_v16 = vmul.f32 0.2, %v164_v0  ;;  %v102_v17 = vmul.f32 %v983_v1, %v39_v6 }
  0x14   :  { %v319_v15 = vsel %vm207_vm9, %v151_v61, %v263_v5  ;;  %v96_v18 = vmul.f32 %v983_v1, %v33_v7  ;;  %v389_v21 = vmul.f32 %v1086_v10, %v326_v9  ;;  %vm220_vm11 = vcmp.ge.f32.partialorder %v164_v0, 0.0  ;;  %v46_v61 = vld [vmem:[%s1557_s0 + $0xc0] sm:$0xff]  ;;  %v35_v7 = vld [vmem:[%s1557_s0 + $0x68] sm:$0x1] }
  0x15   :  { %439 = vadd.xlane.f32.xlu0 %v381_v57  ;;  %v337_v23 = vsel %vm225_vm10, %v169_v63, %v281_v11  ;;  %v264_v24 = vmul.f32 0.2, %v152_v13  ;;  %v170_v25 = vadd.f32 %v988_v2, %v107_v14  ;;  %v165_v27 = vadd.f32 %v988_v2, %v102_v17 }
  0x16   :  { %v382_v29 = vmul.f32 %v1086_v10, %v319_v15  ;;  %vm208_vm12 = vcmp.ge.f32.partialorder %v152_v13, 0.0  ;;  %v113_v30 = vmul.f32 %v983_v1, %v50_v19  ;;  %v332_v32 = vsel %vm220_vm11, %v164_v0, %v276_v16  ;;  %v58_v0 = vld [vmem:[%s1557_s0 + $0x120] sm:$0xff]  ;;  %v1167_v19 = vld [vmem:[%s1560_s1 + $0x28] sm:$0xff] }
  0x17   :  { %468 = vadd.xlane.f32.xlu1 %v394_v8  ;;  %v282_v33 = vmul.f32 0.2, %v170_v25  ;;  %v159_v34 = vadd.f32 %v988_v2, %v96_v18  ;;  %v108_v35 = vmul.f32 %v983_v1, %v45_v22  ;;  %v400_v36 = vmul.f32 %v1021_v20, %v337_v23  ;;  %v28_v18 = vld [vmem:[%s1557_s0 + $0x30] sm:$0x1] }
  0x18   :  { %vm226_vm13 = vcmp.ge.f32.partialorder %v170_v25, 0.0  ;;  %v90_v37 = vmul.f32 %v983_v1, %v27_v28  ;;  %v320_v38 = vsel %vm208_vm12, %v152_v13, %v264_v24  ;;  %v277_v40 = vmul.f32 0.2, %v165_v27 }
  0x19   :  { %466 = vadd.xlane.f32.xlu0 %v393_v12  ;;  %v176_v41 = vadd.f32 %v988_v2, %v113_v30  ;;  %v114_v42 = vmul.f32 %v983_v1, %v51_v31  ;;  %v395_v43 = vmul.f32 %v1056_v45, %v332_v32  ;;  %vm221_vm14 = vcmp.ge.f32.partialorder %v165_v27, 0.0  ;;  %v57_v12 = vld [vmem:[%s1557_s0 + $0x118] sm:$0xff]  ;;  %v47_v31 = vld [vmem:[%s1557_s0 + $0xc8] sm:$0xff] }
  0x1a   :  { %v338_v46 = vsel %vm226_vm13, %v170_v25, %v282_v33  ;;  %v271_v47 = vmul.f32 0.2, %v159_v34  ;;  %v171_v48 = vadd.f32 %v988_v2, %v108_v35  ;;  %v383_v50 = vmul.f32 %v1117_v39, %v320_v38  ;;  %v41_v35 = vld [vmem:[%s1557_s0 + $0x98] sm:$0xff] }
  0x1b   :  { %457 = vadd.xlane.f32.xlu1 %v389_v21  ;;  %vm215_vm15 = vcmp.ge.f32.partialorder %v159_v34, 0.0  ;;  %v153_v51 = vadd.f32 %v988_v2, %v90_v37  ;;  %v333_v52 = vsel %vm221_vm14, %v165_v27, %v277_v40  ;;  %v288_v53 = vmul.f32 0.2, %v176_v41 }
  0x1c   :  { %v177_v54 = vadd.f32 %v988_v2, %v114_v42  ;;  %v103_v55 = vmul.f32 %v983_v1, %v40_v44  ;;  %v401_v56 = vmul.f32 %v1028_v26, %v338_v46  ;;  %vm232_vm0 = vcmp.ge.f32.partialorder %v176_v41, 0.0 }
  0x1d   :  { %441 = vadd.xlane.f32.xlu0 %v382_v29  ;;  %v97_v57 = vmul.f32 %v983_v1, %v34_v49  ;;  %v327_v59 = vsel %vm215_vm15, %v159_v34, %v271_v47  ;;  %v283_v60 = vmul.f32 0.2, %v171_v48  ;;  %v396_v62 = vmul.f32 %v1086_v10, %v333_v52  ;;  %v59_v49 = vld [vmem:[%s1557_s0 + $0x128] sm:$0xff] }
  0x1e   :  { %vm227_vm1 = vcmp.ge.f32.partialorder %v171_v48, 0.0  ;;  %vm209_vm2 = vcmp.ge.f32.partialorder %v153_v51, 0.0  ;;  %v265_v63 = vmul.f32 0.2, %v153_v51  ;;  %v344_v3 = vsel %vm232_vm0, %v176_v41, %v288_v53  ;;  %v53_v53 = vld [vmem:[%s1557_s0 + $0xf8] sm:$0xff] }
  0x1f   :  { %481 = vadd.xlane.f32.xlu1 %v400_v36  ;;  %v289_v4 = vmul.f32 0.2, %v177_v54  ;;  %v166_v5 = vadd.f32 %v988_v2, %v103_v55  ;;  %v115_v6 = vmul.f32 %v983_v1, %v52_v58  ;;  %v390_v8 = vmul.f32 %v1117_v39, %v327_v59 }
  0x20   :  { %vm233_vm3 = vcmp.ge.f32.partialorder %v177_v54, 0.0  ;;  %v160_v9 = vadd.f32 %v988_v2, %v97_v57  ;;  %v109_v11 = vmul.f32 %v983_v1, %v46_v61  ;;  %v339_v13 = vsel %vm227_vm1, %v171_v48, %v283_v60  ;;  %v65_v57 = vld [vmem:[%s1557_s0 + $0x158] sm:$0xff]  ;;  %v64_v61 = vld [vmem:[%s1557_s0 + $0x150] sm:$0xff] }
  0x21   :  { %470 = vadd.xlane.f32.xlu0 %v395_v43  ;;  %v121_v14 = vmul.f32 %v983_v1, %v58_v0  ;;  %v407_v15 = vmul.f32 %v1021_v20, %v344_v3  ;;  %v321_v16 = vsel %vm209_vm2, %v153_v51, %v265_v63  ;;  %v98_v17 = vmul.f32 %v983_v1, %v35_v7  ;;  %v1209_v63 = vld [vmem:[%s1560_s1 + $0x30] sm:$0x1] }
  0x22   :  { %v345_v21 = vsel %vm233_vm3, %v177_v54, %v289_v4  ;;  %v278_v22 = vmul.f32 0.2, %v166_v5  ;;  %v178_v23 = vadd.f32 %v988_v2, %v115_v6  ;;  %v120_v24 = vmul.f32 %v983_v1, %v57_v12  ;;  %v48_v12 = vld [vmem:[%s1557_s0 + $0xd0] sm:$0xff] }
  0x23   :  { %443 = vadd.xlane.f32.xlu1 %v383_v50  ;;  %v402_v25 = vmul.f32 %v1056_v45, %v339_v13  ;;  %vm222_vm4 = vcmp.ge.f32.partialorder %v166_v5, 0.0  ;;  %v272_v27 = vmul.f32 0.2, %v160_v9  ;;  %v172_v28 = vadd.f32 %v988_v2, %v109_v11  ;;  %v71_v13 = vld [vmem:[%s1557_s0 + $0x188] sm:$0xff] }
  0x24   :  { %vm216_vm5 = vcmp.ge.f32.partialorder %v160_v9, 0.0  ;;  %v184_v29 = vadd.f32 %v988_v2, %v121_v14  ;;  %v91_v30 = vmul.f32 %v983_v1, %v28_v18  ;;  %v384_v32 = vmul.f32 %v1167_v19, %v321_v16 }
  0x25   :  { %483 = vadd.xlane.f32.xlu0 %v401_v56  ;;  %v408_v33 = vmul.f32 %v1028_v26, %v345_v21  ;;  %v161_v34 = vadd.f32 %v988_v2, %v98_v17  ;;  %v334_v36 = vsel %vm222_vm4, %v166_v5, %v278_v22  ;;  %vm234_vm6 = vcmp.ge.f32.partialorder %v178_v23, 0.0  ;;  %v42_v17 = vld [vmem:[%s1557_s0 + $0xa0] sm:$0x1] }
  0x26   :  { %v290_v37 = vmul.f32 0.2, %v178_v23  ;;  %v183_v38 = vadd.f32 %v988_v2, %v120_v24  ;;  %v328_v40 = vsel %vm216_vm5, %v160_v9, %v272_v27  ;;  %v284_v41 = vmul.f32 0.2, %v172_v28 }
  0x27   :  { %472 = vadd.xlane.f32.xlu1 %v396_v62  ;;  %v154_v42 = vadd.f32 %v988_v2, %v91_v30  ;;  %v110_v43 = vmul.f32 %v983_v1, %v47_v31  ;;  %vm228_vm7 = vcmp.ge.f32.partialorder %v172_v28, 0.0  ;;  %v296_v44 = vmul.f32 0.2, %v184_v29 }
  0x28   :  { %v104_v46 = vmul.f32 %v983_v1, %v41_v35  ;;  %v397_v47 = vmul.f32 %v1117_v39, %v334_v36  ;;  %vm240_vm8 = vcmp.ge.f32.partialorder %v184_v29, 0.0  ;;  %v273_v48 = vmul.f32 0.2, %v161_v34  ;;  %v60_v36 = vld [vmem:[%s1557_s0 + $0x130] sm:$0xff] }
  0x29   :  { %459 = vadd.xlane.f32.xlu0 %v390_v8  ;;  %v391_v50 = vmul.f32 %v1167_v19, %v328_v40  ;;  %v346_v51 = vsel %vm234_vm6, %v178_v23, %v290_v37  ;;  %v295_v52 = vmul.f32 0.2, %v183_v38  ;;  %vm217_vm9 = vcmp.ge.f32.partialorder %v161_v34, 0.0 }
  0x2a   :  { %v340_v54 = vsel %vm228_vm7, %v172_v28, %v284_v41  ;;  %vm239_vm10 = vcmp.ge.f32.partialorder %v183_v38, 0.0  ;;  %v266_v55 = vmul.f32 0.2, %v154_v42  ;;  %v173_v56 = vadd.f32 %v988_v2, %v110_v43  ;;  %v72_v43 = vld [vmem:[%s1557_s0 + $0x190] sm:$0xff] }
  0x2b   :  { %496 = vadd.xlane.f32.xlu1 %v407_v15  ;;  %v352_v58 = vsel %vm240_vm8, %v184_v29, %v296_v44  ;;  %vm210_vm11 = vcmp.ge.f32.partialorder %v154_v42, 0.0  ;;  %v167_v59 = vadd.f32 %v988_v2, %v104_v46  ;;  %v122_v60 = vmul.f32 %v983_v1, %v59_v49 }
  0x2c   :  { %v329_v62 = vsel %vm217_vm9, %v161_v34, %v273_v48  ;;  %vm447_vm12 = vcmask 1040384   ;;  %v116_v0 = vmul.f32 %v983_v1, %v53_v53  ;;  %v409_v3 = vmul.f32 %v1056_v45, %v346_v51  ;;  %v54_v48 = vld [vmem:[%s1557_s0 + $0x100] sm:$0xff] }
  0x2d   :  { %485 = vadd.xlane.f32.xlu0 %v402_v25  ;;  %v403_v4 = vmul.f32 %v1086_v10, %v340_v54  ;;  %v351_v5 = vsel %vm239_vm10, %v183_v38, %v295_v52  ;;  %v128_v6 = vmul.f32 %v983_v1, %v65_v57  ;;  %v415_v7 = vmul.f32 %v1028_v26, %v352_v58  ;;  %v66_v38 = vld [vmem:[%s1557_s0 + $0x160] sm:$0xff] }
  0x2e   :  { %v322_v8 = vsel %vm210_vm11, %v154_v42, %v266_v55  ;;  %v285_v9 = vmul.f32 0.2, %v173_v56  ;;  %v127_v11 = vmul.f32 %v983_v1, %v64_v61  ;;  %v392_v14 = vmul.f32 %v1209_v63, %v329_v62 }
  0x2f   :  { %445 = vadd.xlane.f32.xlu1 %v384_v32  ;;  %vm229_vm13 = vcmp.ge.f32.partialorder %v173_v56, 0.0  ;;  %v279_v15 = vmul.f32 0.2, %v167_v59  ;;  %v185_v16 = vadd.f32 %v988_v2, %v122_v60  ;;  %v414_v18 = vmul.f32 %v1021_v20, %v351_v5 }
  0x30   :  { %vm223_vm14 = vcmp.ge.f32.partialorder %v167_v59, 0.0  ;;  %v179_v21 = vadd.f32 %v988_v2, %v116_v0  ;;  %v190_v22 = vadd.f32 %v988_v2, %v127_v11  ;;  %v385_v23 = vmul.f32 %v1209_v63, %v322_v8  ;;  %v73_v0 = vld [vmem:[%s1557_s0 + $0x198] sm:$0xff] }
  0x31   :  { %498 = vadd.xlane.f32.xlu0 %v408_v33  ;;  %v191_v24 = vadd.f32 %v988_v2, %v128_v6  ;;  %v111_v25 = vmul.f32 %v983_v1, %v48_v12  ;;  %v134_v27 = vmul.f32 %v983_v1, %v71_v13  ;;  %v341_v28 = vsel %vm229_vm13, %v173_v56, %v285_v9  ;;  %v67_v13 = vld [vmem:[%s1557_s0 + $0x168] sm:$0xff] }
  0x32   :  { %vm246_vm15 = vcmp.ge.f32.partialorder %v190_v22, 0.0  ;;  %v302_v29 = vmul.f32 0.2, %v190_v22  ;;  %v105_v30 = vmul.f32 %v983_v1, %v42_v17  ;;  %v463_v31 = vsel %vm447_vm12, %v392_v14, 0.0 }
  0x33   :  { %474 = vadd.xlane.f32.xlu1 %v397_v47  ;;  %v335_v32 = vsel %vm223_vm14, %v167_v59, %v279_v15  ;;  %vm241_vm0 = vcmp.ge.f32.partialorder %v185_v16, 0.0  ;;  %v297_v33 = vmul.f32 0.2, %v185_v16  ;;  %v291_v34 = vmul.f32 0.2, %v179_v21 }
  0x34   :  { %v358_v35 = vsel %vm246_vm15, %v190_v22, %v302_v29  ;;  %v197_v37 = vadd.f32 %v988_v2, %v134_v27  ;;  %v404_v40 = vmul.f32 %v1117_v39, %v341_v28  ;;  %vm235_vm1 = vcmp.ge.f32.partialorder %v179_v21, 0.0 }
  0x35   :  { %461 = vadd.xlane.f32.xlu0 %v391_v50  ;;  %v1247_v41 = vmul.f32 %v1021_v20, %v358_v35  ;;  %v174_v42 = vadd.f32 %v988_v2, %v111_v25  ;;  %v448_v44 = vsel %vm447_vm12, %v385_v23, 0.0  ;;  %v398_v46 = vmul.f32 %v1167_v19, %v335_v32 }
  0x36   :  { %vm247_vm2 = vcmp.ge.f32.partialorder %v191_v24, 0.0  ;;  %v168_v47 = vadd.f32 %v988_v2, %v105_v30  ;;  %v123_v49 = vmul.f32 %v983_v1, %v60_v36  ;;  %vm253_vm3 = vcmp.ge.f32.partialorder %v197_v37, 0.0 }
  0x37   :  { %500 = vadd.xlane.f32.xlu1 %v409_v3  ;;  %v309_v50 = vmul.f32 0.2, %v197_v37  ;;  %v129_v51 = vmul.f32 %v983_v1, %v66_v38  ;;  %v353_v52 = vsel %vm241_vm0, %v185_v16, %v297_v33  ;;  %v347_v53 = vsel %vm235_vm1, %v179_v21, %v291_v34  ;;  %v68_v21 = vld [vmem:[%s1557_s0 + $0x170] sm:$0xff]  ;;  %v61_v34 = vld [vmem:[%s1557_s0 + $0x138] sm:$0xff] }
  0x38   :  { %v303_v54 = vmul.f32 0.2, %v191_v24  ;;  %v135_v55 = vmul.f32 %v983_v1, %v72_v43  ;;  %v286_v56 = vmul.f32 0.2, %v174_v42  ;;  %v117_v57 = vmul.f32 %v983_v1, %v54_v48 }
  0x39   :  { %487 = vadd.xlane.f32.xlu0 %v403_v4  ;;  %v365_v58 = vsel %vm253_vm3, %v197_v37, %v309_v50  ;;  %v192_v59 = vadd.f32 %v988_v2, %v129_v51  ;;  %vm230_vm4 = vcmp.ge.f32.partialorder %v174_v42, 0.0  ;;  %v280_v60 = vmul.f32 0.2, %v168_v47 }
  0x3a   :  { %v1266_v61 = vmul.f32 %v1021_v20, %v365_v58  ;;  %v198_v62 = vadd.f32 %v988_v2, %v135_v55  ;;  %vm224_vm5 = vcmp.ge.f32.partialorder %v168_v47, 0.0  ;;  %v186_v3 = vadd.f32 %v988_v2, %v123_v49  ;;  %v49_v20 = vld [vmem:[%s1557_s0 + $0xd8] sm:$0x1] }
  0x3b   :  { %513 = vadd.xlane.f32.xlu1 %v415_v7  ;;  %vm248_vm6 = vcmp.ge.f32.partialorder %v192_v59, 0.0  ;;  %v304_v4 = vmul.f32 0.2, %v192_v59  ;;  %v416_v5 = vmul.f32 %v1056_v45, %v353_v52  ;;  %v359_v6 = vsel %vm247_vm2, %v191_v24, %v303_v54 }
  0x3c   :  { %vm254_vm7 = vcmp.ge.f32.partialorder %v198_v62, 0.0  ;;  %v310_v7 = vmul.f32 0.2, %v198_v62  ;;  %v342_v8 = vsel %vm230_vm4, %v174_v42, %v286_v56  ;;  %v180_v9 = vadd.f32 %v988_v2, %v117_v57 }
  0x3d   :  { %511 = vadd.xlane.f32.xlu0 %v414_v18  ;;  %v360_v11 = vsel %vm248_vm6, %v192_v59, %v304_v4  ;;  %v136_v12 = vmul.f32 %v983_v1, %v73_v0  ;;  %v410_v14 = vmul.f32 %v1086_v10, %v347_v53  ;;  %v336_v15 = vsel %vm224_vm5, %v168_v47, %v280_v60  ;;  %v74_v18 = vld [vmem:[%s1557_s0 + $0x1a0] sm:$0xff]  ;;  %v56_v0 = vld [vmem:[%s1557_s0 + $0x110] sm:$0x1] }
  0x3e   :  { %v1286_v16 = vmul.f32 %v1056_v45, %v360_v11  ;;  %v366_v17 = vsel %vm254_vm7, %v198_v62, %v310_v7  ;;  %v422_v22 = vmul.f32 %v1028_v26, %v359_v6  ;;  %v298_v23 = vmul.f32 0.2, %v186_v3 }
  0x3f   :  { %464 = vadd.xlane.f32.xlu1 %v463_v31  ;;  %v112_v24 = vmul.f32 %v983_v1, %v49_v20  ;;  %v1297_v25 = vmul.f32 %v1028_v26, %v366_v17  ;;  %v405_v27 = vmul.f32 %v1167_v19, %v342_v8  ;;  %vm242_vm8 = vcmp.ge.f32.partialorder %v186_v3, 0.0  ;;  %v69_v26 = vld [vmem:[%s1557_s0 + $0x178] sm:$0xff] }
  0x40   :  { %v199_v28 = vadd.f32 %v988_v2, %v136_v12  ;;  %v130_v29 = vmul.f32 %v983_v1, %v67_v13  ;;  %v399_v30 = vmul.f32 %v1209_v63, %v336_v15  ;;  %v292_v31 = vmul.f32 0.2, %v180_v9 }
  0x41   :  { %449 = vadd.xlane.f32.xlu0 %v448_v44  ;;  %v137_v32 = vmul.f32 %v983_v1, %v74_v18  ;;  %v131_v33 = vmul.f32 %v983_v1, %v68_v21  ;;  %vm236_vm9 = vcmp.ge.f32.partialorder %v180_v9, 0.0  ;;  %v354_v37 = vsel %vm242_vm8, %v186_v3, %v298_v23 }
  0x42   :  { %vm255_vm10 = vcmp.ge.f32.partialorder %v199_v28, 0.0  ;;  %v311_v35 = vmul.f32 0.2, %v199_v28  ;;  %v193_v36 = vadd.f32 %v988_v2, %v130_v29  ;;  %v175_v38 = vadd.f32 %v988_v2, %v112_v24 }
  0x43   :  { %489 = vadd.xlane.f32.xlu1 %v404_v40  ;;  %v55_v40 = vld [vmem:[%s1557_s0 + $0x108] sm:$0xff]  ;;  %v200_v42 = vadd.f32 %v988_v2, %v137_v32  ;;  %v194_v43 = vadd.f32 %v988_v2, %v131_v33  ;;  %v132_v47 = vmul.f32 %v983_v1, %v69_v26  ;;  %v478_v48 = vsel %vm447_vm12, %v399_v30, 0.0 }
  0x44   :  { %v367_v44 = vsel %vm255_vm10, %v199_v28, %v311_v35  ;;  %vm249_vm11 = vcmp.ge.f32.partialorder %v193_v36, 0.0  ;;  %v348_v49 = vsel %vm236_vm9, %v180_v9, %v292_v31  ;;  %v124_v50 = vmul.f32 %v983_v1, %v61_v34  ;;  %v62_v9 = vld [vmem:[%s1557_s0 + $0x140] sm:$0xff]  ;;  %v63_v30 = vld [vmem:[%s1557_s0 + $0x148] sm:$0x1] }
  0x45   :  { %476 = vadd.xlane.f32.xlu0 %v398_v46  ;;  %v305_v46 = vmul.f32 0.2, %v193_v36  ;;  %v1323_v51 = vmul.f32 %v1056_v45, %v367_v44  ;;  %v118_v52 = vmul.f32 %v983_v1, %v55_v40  ;;  %vm256_vm13 = vcmp.ge.f32.partialorder %v200_v42, 0.0  ;;  %v75_v45 = vld [vmem:[%s1557_s0 + $0x1a8] sm:$0xff] }
  0x46   :  { %v312_v54 = vmul.f32 0.2, %v200_v42  ;;  %v287_v55 = vmul.f32 0.2, %v175_v38  ;;  %vm250_vm14 = vcmp.ge.f32.partialorder %v194_v43, 0.0  ;;  %vm231_vm15 = vcmp.ge.f32.partialorder %v175_v38, 0.0 }
  0x47   :  { %515 = vadd.xlane.f32.xlu1 %v416_v5  ;;  %v361_v53 = vsel %vm249_vm11, %v193_v36, %v305_v46  ;;  %v306_v57 = vmul.f32 0.2, %v194_v43  ;;  %v195_v59 = vadd.f32 %v988_v2, %v132_v47  ;;  %v417_v60 = vmul.f32 %v1086_v10, %v354_v37  ;;  %v77_v47 = vld [vmem:[%s1557_s0 + $0x1b8] sm:$0x1] }
  0x48   :  { %v1328_v56 = vmul.f32 %v1086_v10, %v361_v53  ;;  %v368_v58 = vsel %vm256_vm13, %v200_v42, %v312_v54  ;;  %v187_v62 = vadd.f32 %v988_v2, %v124_v50  ;;  %v411_v5 = vmul.f32 %v1117_v39, %v348_v49 }
  0x49   :  { %502 = vadd.xlane.f32.xlu0 %v410_v14  ;;  %v1343_v3 = vmul.f32 %v1086_v10, %v368_v58  ;;  %v362_v4 = vsel %vm250_vm14, %v194_v43, %v306_v57  ;;  %vm251_vm0 = vcmp.ge.f32.partialorder %v195_v59, 0.0  ;;  %v307_v20 = vmul.f32 0.2, %v195_v59 }
  0x4a   :  { %v1347_v6 = vmul.f32 %v1117_v39, %v362_v4  ;;  %v343_v7 = vsel %vm231_vm15, %v175_v38, %v287_v55  ;;  %v181_v8 = vadd.f32 %v988_v2, %v118_v52  ;;  %v138_v10 = vmul.f32 %v983_v1, %v75_v45  ;;  %v70_v38 = vld [vmem:[%s1557_s0 + $0x180] sm:$0x1] }
  0x4b   :  { %528 = vadd.xlane.f32.xlu1 %v422_v22  ;;  %v119_v12 = vmul.f32 %v983_v1, %v56_v0  ;;  %v363_v13 = vsel %vm251_vm0, %v195_v59, %v307_v20  ;;  %v299_v14 = vmul.f32 0.2, %v187_v62  ;;  %v406_v18 = vmul.f32 %v1209_v63, %v343_v7 }
  0x4c   :  { %v1358_v15 = vmul.f32 %v1167_v19, %v363_v13  ;;  %v201_v17 = vadd.f32 %v988_v2, %v138_v10  ;;  %vm243_vm1 = vcmp.ge.f32.partialorder %v187_v62, 0.0  ;;  %v125_v21 = vmul.f32 %v983_v1, %v62_v9 }
  0x4d   :  { %526 = vadd.xlane.f32.xlu0 %v1247_v41  ;;  %v76_v41 = vld [vmem:[%s1557_s0 + $0x1b0] sm:$0xff]  ;;  %v293_v23 = vmul.f32 0.2, %v181_v8  ;;  %vm237_vm3 = vcmp.ge.f32.partialorder %v181_v8, 0.0  ;;  %v355_v29 = vsel %vm243_vm1, %v187_v62, %v299_v14  ;;  %v493_v32 = vsel %vm447_vm12, %v406_v18, 0.0 }
  0x4e   :  { %v139_v11 = vmul.f32 %v983_v1, %v76_v41  ;;  %vm257_vm2 = vcmp.ge.f32.partialorder %v201_v17, 0.0  ;;  %v313_v24 = vmul.f32 0.2, %v201_v17  ;;  %v188_v33 = vadd.f32 %v988_v2, %v125_v21 }
  0x4f   :  { %491 = vadd.xlane.f32.xlu1 %v405_v27  ;;  %v182_v27 = vadd.f32 %v988_v2, %v119_v12  ;;  %v349_v35 = vsel %vm237_vm3, %v181_v8, %v293_v23  ;;  %v133_v43 = vmul.f32 %v983_v1, %v70_v38  ;;  %v140_v49 = vmul.f32 %v983_v1, %v77_v47 }
  0x50   :  { %v202_v22 = vadd.f32 %v988_v2, %v139_v11  ;;  %v369_v31 = vsel %vm257_vm2, %v201_v17, %v313_v24  ;;  %v412_v40 = vmul.f32 %v1167_v19, %v349_v35  ;;  %v300_v42 = vmul.f32 0.2, %v188_v33 }
  0x51   :  { %479 = vadd.xlane.f32.xlu0 %v478_v48  ;;  %v432_v26 = vmul.f32 %v1117_v39, %v369_v31  ;;  %v294_v37 = vmul.f32 0.2, %v182_v27  ;;  %vm238_vm5 = vcmp.ge.f32.partialorder %v182_v27, 0.0  ;;  %vm244_vm6 = vcmp.ge.f32.partialorder %v188_v33, 0.0 }
  0x52   :  { %vm258_vm4 = vcmp.ge.f32.partialorder %v202_v22, 0.0  ;;  %v314_v28 = vmul.f32 0.2, %v202_v22  ;;  %v356_v48 = vsel %vm244_vm6, %v188_v33, %v300_v42  ;;  %v203_v55 = vadd.f32 %v988_v2, %v140_v49 }
  0x53   :  { %517 = vadd.xlane.f32.xlu1 %v417_v60  ;;  %v350_v44 = vsel %vm238_vm5, %v182_v27, %v294_v37  ;;  %v419_v52 = vmul.f32 %v1167_v19, %v356_v48  ;;  %v10_v60 = vstv %s1561_s4  ;;  %v612_v62 = vlaneseq }
  0x54   :  { %v370_v34 = vsel %vm258_vm4, %v202_v22, %v314_v28  ;;  %v315_v59 = vmul.f32 0.2, %v203_v55  ;;  %vm259_vm9 = vcmp.ge.f32.partialorder %v203_v55, 0.0  ;;  %11 = vst [vmem:[#allocation2] sm:$0x1] %v10_v60  ;;  %vm630_vm10 = vcmask 195712  }
  0x55   :  { %504 = vadd.xlane.f32.xlu0 %v411_v5  ;;  %v433_v36 = vmul.f32 %v1167_v19, %v370_v34  ;;  %v1406_v0 = vand.u32 127, %v612_v62  ;;  %vm637_vm11 = vcmask 261312   ;;  %vm644_vm13 = vcmask 326912  }
  0x56   :  { %vm651_vm14 = vcmask 392512   ;;  %vm658_vm15 = vcmask 458112   ;;  %vm898_vm0 = vcmask 1041409   ;;  %vm900_vm1 = vcmask 1042434  }
  0x57   :  { %541 = vadd.xlane.f32.xlu1 %v1266_v61  ;;  %v126_v61 = vmul.f32 %v983_v1, %v63_v30  ;;  %v618_v4 = vadd.s32 4294967288, %v1406_v0  ;;  %v625_v7 = vadd.s32 4294967280, %v1406_v0  ;;  %v632_v23 = vadd.s32 4294967272, %v1406_v0 }
  0x58   :  { %v639_v37 = vadd.s32 4294967264, %v1406_v0  ;;  %vm902_vm2 = vcmask 1043459   ;;  %vm904_vm3 = vcmask 1044484   ;;  %vm906_vm4 = vcmask 1045509  }
  0x59   :  { %530 = vadd.xlane.f32.xlu0 %v1286_v16  ;;  %v418_v16 = vmul.f32 %v1117_v39, %v355_v29  ;;  %v189_v46 = vadd.f32 %v988_v2, %v126_v61  ;;  %v413_v39 = vmul.f32 %v1209_v63, %v350_v44  ;;  %vm908_vm5 = vcmask 1046534  }
  0x5a   :  { %vm910_vm6 = vcmask 1047559  }
  0x5b   :  { %494 = vadd.xlane.f32.xlu1 %v493_v32  ;;  %v301_v50 = vmul.f32 0.2, %v189_v46  ;;  %vm245_vm7 = vcmp.ge.f32.partialorder %v189_v46, 0.0  ;;  %v508_v53 = vsel %vm447_vm12, %v413_v39, 0.0 }
  0x5d   :  { %543 = vadd.xlane.f32.xlu0 %v1297_v25  ;;  %v196_v25 = vadd.f32 %v988_v2, %v133_v43  ;;  %v357_v57 = vsel %vm245_vm7, %v189_v46, %v301_v50  ;;  %vm913_vm7 = vcmask 400384  }
  0x5e   :  { %v420_v58 = vmul.f32 %v1209_v63, %v357_v57  ;;  %v646_v57 = vadd.s32 4294967256, %v1406_v0 }
  0x5f   :  { %519 = vadd.xlane.f32.xlu1 %v418_v16  ;;  %v308_v54 = vmul.f32 0.2, %v196_v25  ;;  %vm252_vm8 = vcmp.ge.f32.partialorder %v196_v25, 0.0 }
  0x61   :  { %506 = vadd.xlane.f32.xlu0 %v412_v40  ;;  %v364_v1 = vsel %vm252_vm8, %v196_v25, %v308_v54 }
  0x62   :  { %v427_v19 = vmul.f32 %v1209_v63, %v364_v1 }
  0x63   :  { %545 = vadd.xlane.f32.xlu1 %v1323_v51  ;;  %v523_v51 = vsel %vm447_vm12, %v420_v58, 0.0 }
  0x64   :  { %v538_v2 = vsel %vm447_vm12, %v427_v19, 0.0 }
  0x65   :  { %532 = vadd.xlane.f32.xlu0 %v1328_v56  ;;  %v371_v56 = vsel %vm259_vm9, %v203_v55, %v315_v59  ;;  %vm934_vm9 = vcmask 7168  }
  0x66   :  { %v434_v45 = vmul.f32 %v1209_v63, %v371_v56 }
  0x67   :  { %521 = vadd.xlane.f32.xlu1 %v419_v52 }
  0x68   :  { %v553_v41 = vsel %vm447_vm12, %v434_v45, 0.0  ;;  %vm623_vm12 = vcmask 130112  }
  0x69   :  { %509 = vadd.xlane.f32.xlu0 %v508_v53 }
  0x6b   :  { %547 = vadd.xlane.f32.xlu1 %v1343_v3  ;;  %v1408_v3 = vshrl.u32 %v612_v62, 7 }
  0x6d   :  { %534 = vadd.xlane.f32.xlu0 %v1347_v6  ;;  %v1413_v63 = vsub.s32 %v1406_v0, %v1408_v3  ;;  %v1416_v20 = vsub.s32 %v618_v4, %v1408_v3  ;;  %v1422_v12 = vsub.s32 %v625_v7, %v1408_v3  ;;  %v1435_v32 = vsub.s32 %v632_v23, %v1408_v3 }
  0x6e   :  { %v1445_v43 = vsub.s32 %v639_v37, %v1408_v3  ;;  %v1460_v56 = vsub.s32 %v646_v57, %v1408_v3 }
  0x6f   :  { %536 = vadd.xlane.f32.xlu1 %v1358_v15 }
  0x71   :  { %524 = vadd.xlane.f32.xlu0 %v523_v51 }
  0x73   :  { %539 = vadd.xlane.f32.xlu1 %v538_v2 }
  0x75   :  { %549 = vadd.xlane.f32.xlu0 %v432_v26 }
  0x77   :  { %554 = vadd.xlane.f32.xlu1 %v553_v41 }
  0x79   :  { %551 = vadd.xlane.f32.xlu0 %v433_v36 }
  0x94   :  { %v452_v5 = vpop.xlane.xlu1 %451 }
  0x95   :  { %v663_v9 = vrot.slane %v452_v5, %v1413_v63 }
  0x96   :  { %v436_v6 = vpop.xlane.xlu0 %435 }
  0x97   :  { %v617_v13 = vrot.slane %v436_v6, %v1413_v63 }
  0x98   :  { %v454_v8 = vpop.xlane.xlu1 %453 }
  0x99   :  { %v667_v10 = vrot.slane %v454_v8, %v1416_v20 }
  0x9a   :  { %v438_v11 = vpop.xlane.xlu0 %437 }
  0x9b   :  { %v622_v14 = vrot.slane %v438_v11, %v1416_v20  ;;  %v668_v15 = vsel %vm623_vm12, %v667_v10, %v663_v9 }
  0x9c   :  { %v456_v18 = vpop.xlane.xlu1 %455 }
  0x9d   :  { %v624_v17 = vsel %vm623_vm12, %v622_v14, %v617_v13  ;;  %v672_v21 = vrot.slane %v456_v18, %v1422_v12  ;;  %v653_v13 = vadd.s32 4294967248, %v1406_v0 }
  0x9e   :  { %v440_v22 = vpop.xlane.xlu0 %439 }
  0x9f   :  { %v629_v24 = vrot.slane %v440_v22, %v1422_v12  ;;  %v673_v27 = vsel %vm630_vm10, %v672_v21, %v668_v15 }
  0xa0   :  { %v469_v29 = vpop.xlane.xlu1 %468 }
  0xa1   :  { %v631_v28 = vsel %vm630_vm10, %v629_v24, %v624_v17  ;;  %v701_v30 = vrot.slane %v469_v29, %v1416_v20  ;;  %v1475_v17 = vsub.s32 %v653_v13, %v1408_v3 }
  0xa2   :  { %v467_v31 = vpop.xlane.xlu0 %466 }
  0xa3   :  { %v697_v33 = vrot.slane %v467_v31, %v1413_v63 }
  0xa4   :  { %v458_v34 = vpop.xlane.xlu1 %457 }
  0xa5   :  { %v702_v26 = vsel %vm623_vm12, %v701_v30, %v697_v33  ;;  %v677_v35 = vrot.slane %v458_v34, %v1435_v32 }
  0xa6   :  { %v442_v36 = vpop.xlane.xlu0 %441 }
  0xa7   :  { %v636_v61 = vrot.slane %v442_v36, %v1435_v32  ;;  %v678_v38 = vsel %vm637_vm11, %v677_v35, %v673_v27 }
  0xa8   :  { %v482_v40 = vpop.xlane.xlu1 %481 }
  0xa9   :  { %v638_v16 = vsel %vm637_vm11, %v636_v61, %v631_v28  ;;  %v731_v25 = vrot.slane %v482_v40, %v1413_v63 }
  0xaa   :  { %v471_v42 = vpop.xlane.xlu0 %470 }
  0xab   :  { %v706_v44 = vrot.slane %v471_v42, %v1422_v12 }
  0xac   :  { %v444_v47 = vpop.xlane.xlu1 %443 }
  0xad   :  { %v707_v46 = vsel %vm630_vm10, %v706_v44, %v702_v26  ;;  %v643_v48 = vrot.slane %v444_v47, %v1445_v43 }
  0xae   :  { %v484_v39 = vpop.xlane.xlu0 %483 }
  0xaf   :  { %v735_v49 = vrot.slane %v484_v39, %v1416_v20  ;;  %v645_v50 = vsel %vm644_vm13, %v643_v48, %v638_v16 }
  0xb0   :  { %v473_v53 = vpop.xlane.xlu1 %472 }
  0xb1   :  { %v736_v52 = vsel %vm623_vm12, %v735_v49, %v731_v25  ;;  %v711_v54 = vrot.slane %v473_v53, %v1435_v32 }
  0xb2   :  { %v460_v55 = vpop.xlane.xlu0 %459 }
  0xb3   :  { %v682_v58 = vrot.slane %v460_v55, %v1445_v43  ;;  %v712_v1 = vsel %vm637_vm11, %v711_v54, %v707_v46 }
  0xb4   :  { %v497_v19 = vpop.xlane.xlu1 %496 }
  0xb5   :  { %v683_v59 = vsel %vm644_vm13, %v682_v58, %v678_v38  ;;  %v765_v4 = vrot.slane %v497_v19, %v1413_v63 }
  0xb6   :  { %v486_v51 = vpop.xlane.xlu0 %485 }
  0xb7   :  { %v740_v2 = vrot.slane %v486_v51, %v1422_v12 }
  0xb8   :  { %v446_v41 = vpop.xlane.xlu1 %445 }
  0xb9   :  { %v741_v45 = vsel %vm630_vm10, %v740_v2, %v736_v52  ;;  %v650_v60 = vrot.slane %v446_v41, %v1460_v56 }
  0xba   :  { %v499_v62 = vpop.xlane.xlu0 %498 }
  0xbb   :  { %v769_v5 = vrot.slane %v499_v62, %v1416_v20  ;;  %v652_v6 = vsel %vm651_vm14, %v650_v60, %v645_v50 }
  0xbc   :  { %v475_v8 = vpop.xlane.xlu1 %474 }
  0xbd   :  { %v770_v7 = vsel %vm623_vm12, %v769_v5, %v765_v4  ;;  %v716_v35 = vrot.slane %v475_v8, %v1445_v43 }
  0xbe   :  { %v462_v9 = vpop.xlane.xlu0 %461 }
  0xbf   :  { %v687_v18 = vrot.slane %v462_v9, %v1460_v56  ;;  %v717_v38 = vsel %vm644_vm13, %v716_v35, %v712_v1 }
  0xc0   :  { %v501_v10 = vpop.xlane.xlu1 %500 }
  0xc1   :  { %v688_v24 = vsel %vm651_vm14, %v687_v18, %v683_v59  ;;  %v774_v2 = vrot.slane %v501_v10, %v1422_v12 }
  0xc2   :  { %v488_v11 = vpop.xlane.xlu0 %487 }
  0xc3   :  { %v745_v48 = vrot.slane %v488_v11, %v1435_v32  ;;  %v775_v5 = vsel %vm630_vm10, %v774_v2, %v770_v7 }
  0xc4   :  { %v1470_v14 = vpop.xlane.xlu1 %513 }
  0xc5   :  { %v746_v52 = vsel %vm637_vm11, %v745_v48, %v741_v45 }
  0xc6   :  { %v1472_v15 = vpop.xlane.xlu0 %511 }
  0xc7   :  { %v799_v7 = vrot.slane %v1472_v15, %v1413_v63 }
  0xc8   :  { %v465_v21 = vpop.xlane.xlu1 %464 }
  0xc9   :  { %v692_v22 = vrot.slane %v465_v21, %v1475_v17 }
  0xca   :  { %v450_v23 = vpop.xlane.xlu0 %449 }
  0xcb   :  { %v657_v27 = vrot.slane %v450_v23, %v1475_v17  ;;  %v693_v0 = vsel %vm658_vm15, %v692_v22, %v688_v24  ;;  %v803_v24 = vrot.slane %v1470_v14, %v1416_v20 }
  0xcc   :  { %v490_v29 = vpop.xlane.xlu1 %489 }
  0xcd   :  { %v659_v28 = vsel %vm658_vm15, %v657_v27, %v652_v6  ;;  %v750_v25 = vrot.slane %v490_v29, %v1445_v43 }
  0xce   :  { %v899_v30 = vsel %vm898_vm0, %v693_v0, %v659_v28  ;;  %v477_v3 = vpop.xlane.xlu0 %476 }
  0xcf   :  { %v721_v36 = vrot.slane %v477_v3, %v1460_v56  ;;  %v751_v54 = vsel %vm644_vm13, %v750_v25, %v746_v52 }
  0xd0   :  { %v516_v31 = vpop.xlane.xlu1 %515 }
  0xd1   :  { %v722_v40 = vsel %vm651_vm14, %v721_v36, %v717_v38  ;;  %v808_v27 = vrot.slane %v516_v31, %v1422_v12 }
  0xd2   :  { %v503_v33 = vpop.xlane.xlu0 %502 }
  0xd3   :  { %v779_v60 = vrot.slane %v503_v33, %v1435_v32  ;;  %v804_v33 = vsel %vm623_vm12, %v803_v24, %v799_v7 }
  0xd4   :  { %v1483_v26 = vpop.xlane.xlu1 %528  ;;  %v809_v14 = vsel %vm630_vm10, %v808_v27, %v804_v33 }
  0xd5   :  { %v780_v8 = vsel %vm637_vm11, %v779_v60, %v775_v5  ;;  %v837_v0 = vrot.slane %v1483_v26, %v1416_v20 }
  0xd6   :  { %v527_v34 = vpop.xlane.xlu0 %526 }
  0xd7   :  { %v833_v28 = vrot.slane %v527_v34, %v1413_v63 }
  0xd8   :  { %v492_v37 = vpop.xlane.xlu1 %491 }
  0xd9   :  { %v755_v50 = vrot.slane %v492_v37, %v1460_v56  ;;  %v838_v31 = vsel %vm623_vm12, %v837_v0, %v833_v28 }
  0xda   :  { %v480_v61 = vpop.xlane.xlu0 %479 }
  0xdb   :  { %v726_v16 = vrot.slane %v480_v61, %v1475_v17  ;;  %v756_v58 = vsel %vm651_vm14, %v755_v50, %v751_v54 }
  0xdc   :  { %v518_v44 = vpop.xlane.xlu1 %517 }
  0xdd   :  { %v727_v42 = vsel %vm658_vm15, %v726_v16, %v722_v40 }
  0xde   :  { %v901_v46 = vsel %vm900_vm1, %v727_v42, %v899_v30  ;;  %v505_v47 = vpop.xlane.xlu0 %504  ;;  %v813_v30 = vrot.slane %v518_v44, %v1435_v32 }
  0xdf   :  { %v784_v62 = vrot.slane %v505_v47, %v1445_v43 }
  0xe0   :  { %v1492_v39 = vpop.xlane.xlu1 %541  ;;  %v814_v38 = vsel %vm637_vm11, %v813_v30, %v809_v14 }
  0xe1   :  { %v785_v11 = vsel %vm644_vm13, %v784_v62, %v780_v8 }
  0xe2   :  { %v531_v49 = vpop.xlane.xlu0 %530 }
  0xe3   :  { %v842_v35 = vrot.slane %v531_v49, %v1422_v12 }
  0xe4   :  { %v495_v53 = vpop.xlane.xlu1 %494 }
  0xe5   :  { %v760_v55 = vrot.slane %v495_v53, %v1475_v17  ;;  %v843_v47 = vsel %vm630_vm10, %v842_v35, %v838_v31 }
  0xe6   :  { %v544_v57 = vpop.xlane.xlu0 %543 }
  0xe7   :  { %v761_v1 = vsel %vm658_vm15, %v760_v55, %v756_v58  ;;  %v871_v26 = vrot.slane %v544_v57, %v1416_v20 }
  0xe8   :  { %v903_v59 = vsel %vm902_vm2, %v761_v1, %v901_v46  ;;  %v520_v19 = vpop.xlane.xlu1 %519  ;;  %v867_v46 = vrot.slane %v1492_v39, %v1413_v63 }
  0xe9   :  { %v818_v36 = vrot.slane %v520_v19, %v1445_v43 }
  0xea   :  { %v507_v51 = vpop.xlane.xlu0 %506  ;;  %v872_v50 = vsel %vm623_vm12, %v871_v26, %v867_v46 }
  0xeb   :  { %v789_v4 = vrot.slane %v507_v51, %v1460_v56  ;;  %v819_v25 = vsel %vm644_vm13, %v818_v36, %v814_v38 }
  0xec   :  { %v546_v41 = vpop.xlane.xlu1 %545 }
  0xed   :  { %v790_v10 = vsel %vm651_vm14, %v789_v4, %v785_v11  ;;  %v876_v16 = vrot.slane %v546_v41, %v1422_v12 }
  0xee   :  { %v533_v45 = vpop.xlane.xlu0 %532 }
  0xef   :  { %v847_v15 = vrot.slane %v533_v45, %v1435_v32  ;;  %v877_v63 = vsel %vm630_vm10, %v876_v16, %v872_v50 }
  0xf0   :  { %v522_v6 = vpop.xlane.xlu1 %521 }
  0xf1   :  { %v823_v34 = vrot.slane %v522_v6, %v1460_v56  ;;  %v848_v49 = vsel %vm637_vm11, %v847_v15, %v843_v47 }
  0xf2   :  { %v510_v9 = vpop.xlane.xlu0 %509 }
  0xf3   :  { %v794_v13 = vrot.slane %v510_v9, %v1475_v17  ;;  %v824_v52 = vsel %vm651_vm14, %v823_v34, %v819_v25 }
  0xf4   :  { %v548_v21 = vpop.xlane.xlu1 %547 }
  0xf5   :  { %v795_v18 = vsel %vm658_vm15, %v794_v13, %v790_v10  ;;  %v881_v20 = vrot.slane %v548_v21, %v1435_v32 }
  0xf6   :  { %v905_v22 = vsel %vm904_vm3, %v795_v18, %v903_v59  ;;  %v535_v23 = vpop.xlane.xlu0 %534 }
  0xf7   :  { %v852_v37 = vrot.slane %v535_v23, %v1445_v43  ;;  %v882_v58 = vsel %vm637_vm11, %v881_v20, %v877_v63 }
  0xf8   :  { %v537_v29 = vpop.xlane.xlu1 %536 }
  0xf9   :  { %v857_v40 = vrot.slane %v537_v29, %v1460_v56  ;;  %v853_v53 = vsel %vm644_vm13, %v852_v37, %v848_v49 }
  0xfa   :  { %v525_v3 = vpop.xlane.xlu0 %524 }
  0xfb   :  { %v828_v42 = vrot.slane %v525_v3, %v1475_v17  ;;  %v858_v32 = vsel %vm651_vm14, %v857_v40, %v853_v53 }
  0xfc   :  { %v540_v61 = vpop.xlane.xlu1 %539 }
  0xfd   :  { %v862_v48 = vrot.slane %v540_v61, %v1475_v17  ;;  %v829_v39 = vsel %vm658_vm15, %v828_v42, %v824_v52 }
  0xfe   :  { %v550_v44 = vpop.xlane.xlu0 %549  ;;  %v907_v51 = vsel %vm906_vm4, %v829_v39, %v905_v22 }
  0xff   :  { %v886_v12 = vrot.slane %v550_v44, %v1445_v43  ;;  %v863_v43 = vsel %vm658_vm15, %v862_v48, %v858_v32 }
 0x100   :  { %v555_v54 = vpop.xlane.xlu1 %554  ;;  %v909_v41 = vsel %vm908_vm5, %v863_v43, %v907_v51 }
 0x101   :  { %v896_v57 = vrot.slane %v555_v54, %v1475_v17  ;;  %v887_v59 = vsel %vm644_vm13, %v886_v12, %v882_v58  ;;  %v942_v17 = vld [vmem:[#allocation2] ss:$0 sm:$0xff] }
 0x102   :  { %v552_v55 = vpop.xlane.xlu0 %551 }
 0x103   :  { %v891_v1 = vrot.slane %v552_v55, %v1460_v56 }
 0x105   :  { %v892_v19 = vsel %vm651_vm14, %v891_v1, %v887_v59 }
 0x106   :  { %v897_v2 = vsel %vm658_vm15, %v896_v57, %v892_v19 }
 0x107   :  { %v911_v60 = vsel %vm910_vm6, %v897_v2, %v909_v41 }
 0x108   :  { %v914_v45 = vsel %vm913_vm7, %v911_v60, 0.0 }
 0x109   :  { %915 = vadd.xlane.f32.xlu0 %v914_v45 }
 0x192   :  { %v916_v62 = vpop.xlane.xlu0 %915 }
 0x193   :  { %v924_v4 = vadd.f32 %v942_v17, %v916_v62 }
 0x195   :  { %vm925_vm8 = vcmp.ge.f32.partialorder %v924_v4, 0.0  ;;  %v926_v5 = vsub.f32 0.0, %v924_v4 }
 0x197   :  { %v927_v56 = vsel %vm925_vm8, %v926_v5, %v924_v4 }
 0x198   :  { %v928_v6 = vmul.f32 1.442695, %v927_v56 }
 0x19a   :  { %943 = vpow2.f32 %v928_v6 }
 0x1a7   :  { %v944_v8 = vpop.eup %943 }
 0x1a8   :  { %v931_v9 = vadd.f32 1.0, %v944_v8  ;;  %v930_v13 = vsel %vm925_vm8, 1.0, %v944_v8 }
 0x1aa   :  { %945 = vrcp.f32 %v931_v9 }
 0x1b7   :  { %v946_v11 = vpop.eup %945 }
 0x1b8   :  { %v933_v10 = vmul.f32 %v946_v11, %v930_v13 }
 0x1ba   :  { %935 = vst.msk [vmem:[%s1562_s5] sm:$0xff] %vm934_vm9, %v933_v10 }

</bundles_post_ra>
